<compile_context>
chip_gen: v5e
topology: v5e:2x2
jax: 0.10.0
libtpu: 0.0.40
codegen_flags: <defaults>
</compile_context>

<pallas_src>
import functools

import jax
import jax.numpy as jnp
import numpy as np
from jax import lax
from jax.experimental import pallas as pl
from jax.experimental.pallas import tpu as pltpu


def _conv_lstm_kernel(num_layers, seq_len, hidden_size, full_unroll,
                      loop_unroll, *refs):
    """Whole forward pass for one batch tile (everything resident in VMEM)."""
    L, T, H = num_layers, seq_len, hidden_size
    x_ref, social_ref, wcat_ref, cb_ref = refs[:4]
    lstm_refs = refs[4:4 + 3 * L]
    n_head = 4 + 3 * L
    ws_ref, bs_ref, wfh_ref, wfs_ref, bf_ref = refs[n_head:n_head + 5]
    out_ref = refs[n_head + 5]
    scratch = refs[n_head + 6:]
    sidx = 0
    xproj_ref = None
    if not full_unroll:
        xproj_ref = scratch[sidx]
        sidx += 1
    seq_ref = scratch[sidx] if L > 1 else None

    BT = x_ref.shape[1]          # batch tile (padded to a sublane multiple)
    c3 = x_ref.shape[2]          # 3 * C_in (im2col)

    # ---- Conv1d(kernel=3, padding=1) + ReLU as a single im2col matmul ----
    x_flat = x_ref[...].reshape(T * BT, c3)                      # t-major rows
    conv = jnp.dot(x_flat.astype(wcat_ref.dtype), wcat_ref[...],
                   preferred_element_type=jnp.float32) + cb_ref[...]
    seq_flat = jnp.maximum(conv, 0.0)                            # (T*BT, c_out)

    # ---- multi-layer LSTM, zero (h, c) init; PyTorch gate order i,f,g,o ----
    h = jnp.zeros((BT, H), jnp.float32)
    for l in range(L):
        w_ih = lstm_refs[3 * l][...]          # (in, 4H)   g-cols pre-scaled x2
        w_hh = lstm_refs[3 * l + 1][...]      # (H, 4H)    g-cols pre-scaled x2
        b = lstm_refs[3 * l + 2][...]         # (1, 4H)    g-slice pre-scaled x2

        # Hoisted input projection for all timesteps at once, bias folded in.
        xp = jnp.dot(seq_flat.astype(w_ih.dtype), w_ih,
                     preferred_element_type=jnp.float32) + b     # (T*BT, 4H)

        h = jnp.zeros((BT, H), jnp.float32)
        c = jnp.zeros((BT, H), jnp.float32)
        write_seq = (l < L - 1)               # last layer only needs final h

        # TODO(synk): pin w_hh in MXU weight registers across the T loop
        # (pltpu.matmul_push_rhs / matmul_acc_lhs / matmul_pop) to drop the
        # per-step RHS push once the recurrent matmul dominates the latency.
        def step(xp_t, h, c, _w_hh=w_hh):
            gates = xp_t + jnp.dot(h.astype(_w_hh.dtype), _w_hh,
                                   preferred_element_type=jnp.float32)  # (BT,4H)
            s = jax.nn.sigmoid(gates)         # ONE full-4H-lane transcendental
            i_g = s[:, 0:H]
            f_g = s[:, H:2 * H]
            g_g = 2.0 * s[:, 2 * H:3 * H] - 1.0   # == tanh(raw g pre-activation)
            o_g = s[:, 3 * H:4 * H]
            c_new = f_g * c + i_g * g_g
            h_new = o_g * jnp.tanh(c_new)
            return h_new, c_new

        if full_unroll:
            # Keep xp as a traced VALUE and use static slices — no VMEM
            # round-trip on the serial critical path.
            xp3 = xp.reshape(T, BT, 4 * H)
            for t in range(T):
                h, c = step(xp3[t], h, c)
                if write_seq:
                    seq_ref[t] = h            # only in-loop store (v5e-friendly)
        else:
            xproj_ref[...] = xp.reshape(T, BT, 4 * H)

            def body(t, carry, _write_seq=write_seq):
                h, c = carry
                h_new, c_new = step(xproj_ref[t], h, c)
                if _write_seq:
                    seq_ref[t] = h_new
                return h_new, c_new

            h, c = lax.fori_loop(0, T, body, (h, c), unroll=loop_unroll)

        if write_seq:
            seq_flat = seq_ref[...].reshape(T * BT, H)
    # h == out[:, -1, :] of the last LSTM layer

    # ---- social branch + split final linear (no lane concat) ----
    social_out = jnp.maximum(
        jnp.dot(social_ref[...].astype(ws_ref.dtype), ws_ref[...],
                preferred_element_type=jnp.float32) + bs_ref[...], 0.0)
    out = (jnp.dot(h.astype(wfh_ref.dtype), wfh_ref[...],
                   preferred_element_type=jnp.float32)
           + jnp.dot(social_out.astype(wfs_ref.dtype), wfs_ref[...],
                     preferred_element_type=jnp.float32)
           + bf_ref[...])
    out_ref[...] = out.astype(out_ref.dtype)


def conv_rnn_forward(params, x, social_features, *, use_bf16_matmul=False):
    """x: (B, T, input_size) float32, social_features: (B, S) float32."""
    B, T, c_in = x.shape
    H = params['hidden_size']
    L = params['num_layers']
    c_out = params['conv_w'].shape[0]
    num_classes = params['fc_final_b'].shape[0]
    S = social_features.shape[1]

    # ---- batch-tile selection: MXU fill, v7x dual-core sharding, VMEM cap ----
    base = 16 if use_bf16_matmul else 8      # sublane multiple (bf16 packs 2x)

    def _round(n):
        return ((n + base - 1) // base) * base

    def _vmem_bytes(bt):
        f = 4
        blocks = 2 * (T * bt * 3 * c_in + bt * S) * f      # 2x-buffered inputs
        w = (3 * c_in * c_out + c_out) * f
        for l in range(L):
            in_dim = c_out if l == 0 else H
            w += (in_dim * 4 * H + H * 4 * H + 4 * H) * f
        w += (S * H + H + 2 * H * num_classes + num_classes) * f
        scr = T * bt * 4 * H * f + (T * bt * H * f if L > 1 else 0)
        live = 3 * T * bt * max(4 * H, c_out, 3 * c_in) * f   # traced temporaries
        out_blk = 2 * bt * num_classes * f
        return blocks + 2 * w + scr + live + out_blk

    Bb = _round(max(B, 1))
    BT = min(128, Bb)
    if Bb >= 2 * base:
        # Ensure >= 2 grid steps so dimension_semantics=("parallel",) can
        # shard across v7x's two TensorCores (neutral on v5e/v6e).
        BT = min(BT, _round((Bb + 1) // 2))
    while BT > base and _vmem_bytes(BT) > 24 * 2**20:   # stay well under 32 MiB
        BT -= base
    B_pad = ((B + BT - 1) // BT) * BT
    vmem_limit = int(min(48 * 2**20, max(2 * _vmem_bytes(BT), 16 * 2**20)))

    full_unroll = (T <= 16) and (BT <= 32)   # keep vreg pressure sane
    loop_unroll = 2 if BT >= 64 else min(4, T)

    if B_pad != B:
        x = jnp.pad(x, ((0, B_pad - B), (0, 0), (0, 0)))
        social_features = jnp.pad(social_features, ((0, B_pad - B), (0, 0)))

    # im2col for Conv1d(k=3, pad=1): (T, B_pad, 3*C_in), t-major layout.
    x_pad = jnp.pad(x, ((0, 0), (1, 1), (0, 0)))
    x_cat = jnp.concatenate(
        [x_pad[:, 0:T, :], x_pad[:, 1:T + 1, :], x_pad[:, 2:T + 2, :]], axis=-1)
    x_cat = jnp.transpose(x_cat, (1, 0, 2))                      # (T, B_pad, 3*C_in)

    mm_dtype = jnp.bfloat16 if use_bf16_matmul else jnp.float32

    # conv weight (C_out, C_in, 3) -> (3*C_in, C_out) matching the im2col order.
    w_cat = jnp.transpose(params['conv_w'], (2, 1, 0)).reshape(3 * c_in, -1)
    w_cat = w_cat.astype(mm_dtype)
    conv_b = params['conv_b'][None, :]                           # (1, C_out)

    def scale_g(w):      # scale the g-gate block (cols 2H:3H) by 2 (tanh trick)
        return w.at[..., 2 * H:3 * H].multiply(2.0)

    lstm_inputs = []
    for l in range(L):
        lstm_inputs.append(scale_g(params['w_ih'][l].T).astype(mm_dtype))     # (in, 4H)
        lstm_inputs.append(scale_g(params['w_hh'][l].T).astype(mm_dtype))     # (H, 4H)
        lstm_inputs.append(
            scale_g(params['b_ih'][l] + params['b_hh'][l])[None, :])          # (1, 4H)

    ws = params['fc_social_w'].T.astype(mm_dtype)   # (S, H)
    bs = params['fc_social_b'][None, :]             # (1, H)
    wf = params['fc_final_w'].T                     # (2H, num_classes) [LSTM ; social]
    wf_h = wf[:H].astype(mm_dtype)                  # (H, num_classes)
    wf_s = wf[H:].astype(mm_dtype)                  # (H, num_classes)
    bf = params['fc_final_b'][None, :]              # (1, num_classes)

    inputs = [x_cat, social_features, w_cat, conv_b,
              *lstm_inputs, ws, bs, wf_h, wf_s, bf]

    def full_spec(a):
        nd = a.ndim
        return pl.BlockSpec(a.shape, lambda i, _nd=nd: (0,) * _nd)

    in_specs = (
        [pl.BlockSpec((T, BT, 3 * c_in), lambda i: (0, i, 0)),
         pl.BlockSpec((BT, S), lambda i: (i, 0))]
        + [full_spec(a) for a in inputs[2:]]
    )
    out_specs = pl.BlockSpec((BT, num_classes), lambda i: (i, 0))

    scratch_shapes = []
    if not full_unroll:
        scratch_shapes.append(pltpu.VMEM((T, BT, 4 * H), jnp.float32))  # X_proj
    if L > 1:
        scratch_shapes.append(pltpu.VMEM((T, BT, H), jnp.float32))      # per-step h

    kernel = functools.partial(_conv_lstm_kernel, L, T, H,
                               full_unroll, loop_unroll)
    out = pl.pallas_call(
        kernel,
        out_shape=jax.ShapeDtypeStruct((B_pad, num_classes), jnp.float32),
        grid=(B_pad // BT,),
        in_specs=in_specs,
        out_specs=out_specs,
        scratch_shapes=scratch_shapes,
        compiler_params=pltpu.CompilerParams(
            dimension_semantics=("parallel",),
            vmem_limit_bytes=vmem_limit),
    )(*inputs)
    return out[:B]


def init_params(key, input_size, hidden_size, num_layers, num_channels,
                social_feature_size, num_classes):
    """Deterministic PyTorch-style uniform(+-1/sqrt(fan_in)) init."""
    keys = iter(jax.random.split(key, 8 + 4 * num_layers))

    def unif(shape, fan_in):
        bound = 1.0 / np.sqrt(fan_in)
        return jax.random.uniform(next(keys), shape, jnp.float32, -bound, bound)

    params = {
        'hidden_size': hidden_size,
        'num_layers': num_layers,
        'conv_w': unif((num_channels, input_size, 3), input_size * 3),
        'conv_b': unif((num_channels,), input_size * 3),
        'w_ih': [], 'w_hh': [], 'b_ih': [], 'b_hh': [],
        'fc_social_w': unif((hidden_size, social_feature_size), social_feature_size),
        'fc_social_b': unif((hidden_size,), social_feature_size),
        'fc_final_w': unif((num_classes, 2 * hidden_size), 2 * hidden_size),
        'fc_final_b': unif((num_classes,), 2 * hidden_size),
    }
    for l in range(num_layers):
        in_dim = num_channels if l == 0 else hidden_size
        params['w_ih'].append(unif((4 * hidden_size, in_dim), hidden_size))
        params['w_hh'].append(unif((4 * hidden_size, hidden_size), hidden_size))
        params['b_ih'].append(unif((4 * hidden_size,), hidden_size))
        params['b_hh'].append(unif((4 * hidden_size,), hidden_size))
    return params


def reference_forward(params, x, social):
    """Pure-JAX reference matching the PyTorch Conv_RNN (Conv_LSTM) semantics."""
    H = params['hidden_size']
    L = params['num_layers']
    xc = jnp.transpose(x, (0, 2, 1))                         # NCH
    y = jax.lax.conv_general_dilated(
        xc, params['conv_w'], window_strides=(1,), padding=[(1, 1)],
        dimension_numbers=('NCH', 'OIH', 'NCH'))
    y = jax.nn.relu(y + params['conv_b'][None, :, None])
    seq = jnp.transpose(y, (0, 2, 1))                        # (B, T, C)
    B, T, _ = seq.shape
    for l in range(L):
        w_ih, w_hh = params['w_ih'][l], params['w_hh'][l]
        b = params['b_ih'][l] + params['b_hh'][l]
        h = jnp.zeros((B, H), jnp.float32)
        c = jnp.zeros((B, H), jnp.float32)
        outs = []
        for t in range(T):
            gates = seq[:, t, :] @ w_ih.T + h @ w_hh.T + b
            i = jax.nn.sigmoid(gates[:, :H])
            f = jax.nn.sigmoid(gates[:, H:2 * H])
            g = jnp.tanh(gates[:, 2 * H:3 * H])
            o = jax.nn.sigmoid(gates[:, 3 * H:])
            c = f * c + i * g
            h = o * jnp.tanh(c)
            outs.append(h)
        seq = jnp.stack(outs, axis=1)
    social_out = jax.nn.relu(social @ params['fc_social_w'].T + params['fc_social_b'])
    combined = jnp.concatenate([seq[:, -1, :], social_out], axis=1)
    return combined @ params['fc_final_w'].T + params['fc_final_b']


if __name__ == "__main__":
    B, T = 2, 8
    input_size = 4
    num_channels = 32
    hidden_size = 32
    num_layers = 2
    social_feature_size = 16
    num_classes = 5

    key = jax.random.PRNGKey(0)
    k_p, k_x, k_s = jax.random.split(key, 3)
    params = init_params(k_p, input_size, hidden_size, num_layers,
                         num_channels, social_feature_size, num_classes)
    x = jax.random.normal(k_x, (B, T, input_size), jnp.float32)
    social = jax.random.normal(k_s, (B, social_feature_size), jnp.float32)

    out = conv_rnn_forward(params, x, social)       # f32 matmuls: tight accuracy
    out = jax.block_until_ready(out)

    ref = reference_forward(params, x, social)
    np.testing.assert_allclose(np.asarray(out), np.asarray(ref),
                               rtol=1e-4, atol=1e-4)
    print("KERNEL_OK")
</pallas_src>

<mosaic_0001>
module attributes {stable_mosaic.version = 11 : i64} {
  func.func @_conv_lstm_kernel(%arg0: i32, %arg1: memref<8x8x12xf32, #tpu.memory_space<vmem>>, %arg2: memref<8x16xf32, #tpu.memory_space<vmem>>, %arg3: memref<12x32xf32, #tpu.memory_space<vmem>>, %arg4: memref<1x32xf32, #tpu.memory_space<vmem>>, %arg5: memref<32x128xf32, #tpu.memory_space<vmem>>, %arg6: memref<32x128xf32, #tpu.memory_space<vmem>>, %arg7: memref<1x128xf32, #tpu.memory_space<vmem>>, %arg8: memref<32x128xf32, #tpu.memory_space<vmem>>, %arg9: memref<32x128xf32, #tpu.memory_space<vmem>>, %arg10: memref<1x128xf32, #tpu.memory_space<vmem>>, %arg11: memref<16x32xf32, #tpu.memory_space<vmem>>, %arg12: memref<1x32xf32, #tpu.memory_space<vmem>>, %arg13: memref<32x5xf32, #tpu.memory_space<vmem>>, %arg14: memref<32x5xf32, #tpu.memory_space<vmem>>, %arg15: memref<1x5xf32, #tpu.memory_space<vmem>>, %arg16: memref<8x5xf32, #tpu.memory_space<vmem>>, %arg17: memref<8x8x32xf32, #tpu.memory_space<vmem>>) attributes {dimension_semantics = [#tpu.dimension_semantics<parallel>], iteration_bounds = array<i64: 1>, scalar_prefetch = 0 : i64, scratch_operands = 1 : i64, tpu.core_type = #tpu.core_type<tc>, window_params = [{transform_indices = @transform_0, window_bounds = array<i64: 8, 8, 12>}, {transform_indices = @transform_1, window_bounds = array<i64: 8, 16>}, {pipeline_mode = #tpu.pipeline_mode<synchronous>, transform_indices = @transform_2, window_bounds = array<i64: 12, 32>}, {pipeline_mode = #tpu.pipeline_mode<synchronous>, transform_indices = @transform_3, window_bounds = array<i64: 1, 32>}, {pipeline_mode = #tpu.pipeline_mode<synchronous>, transform_indices = @transform_4, window_bounds = array<i64: 32, 128>}, {pipeline_mode = #tpu.pipeline_mode<synchronous>, transform_indices = @transform_5, window_bounds = array<i64: 32, 128>}, {pipeline_mode = #tpu.pipeline_mode<synchronous>, transform_indices = @transform_6, window_bounds = array<i64: 1, 128>}, {pipeline_mode = #tpu.pipeline_mode<synchronous>, transform_indices = @transform_7, window_bounds = array<i64: 32, 128>}, {pipeline_mode = #tpu.pipeline_mode<synchronous>, transform_indices = @transform_8, window_bounds = array<i64: 32, 128>}, {pipeline_mode = #tpu.pipeline_mode<synchronous>, transform_indices = @transform_9, window_bounds = array<i64: 1, 128>}, {pipeline_mode = #tpu.pipeline_mode<synchronous>, transform_indices = @transform_10, window_bounds = array<i64: 16, 32>}, {pipeline_mode = #tpu.pipeline_mode<synchronous>, transform_indices = @transform_11, window_bounds = array<i64: 1, 32>}, {pipeline_mode = #tpu.pipeline_mode<synchronous>, transform_indices = @transform_12, window_bounds = array<i64: 32, 5>}, {pipeline_mode = #tpu.pipeline_mode<synchronous>, transform_indices = @transform_13, window_bounds = array<i64: 32, 5>}, {pipeline_mode = #tpu.pipeline_mode<synchronous>, transform_indices = @transform_14, window_bounds = array<i64: 1, 5>}, {transform_indices = @transform_15, window_bounds = array<i64: 8, 5>}]} {
    %c0 = arith.constant 0 : index
    %c0_0 = arith.constant 0 : index
    %c0_1 = arith.constant 0 : index
    %0 = vector.load %arg1[%c0, %c0_0, %c0_1] : memref<8x8x12xf32, #tpu.memory_space<vmem>>, vector<8x8x12xf32>
    %1 = vector.shape_cast %0 : vector<8x8x12xf32> to vector<64x12xf32>
    %c0_2 = arith.constant 0 : index
    %c0_3 = arith.constant 0 : index
    %2 = vector.load %arg3[%c0_2, %c0_3] : memref<12x32xf32, #tpu.memory_space<vmem>>, vector<12x32xf32>
    %cst = arith.constant dense<0.000000e+00> : vector<64x32xf32>
    %3 = tpu.matmul %1, %2, %cst {dimension_numbers = #tpu.dot_dimension_numbers<[1], [0], [0], [1], [0, 0, 1, 1], [], []>} : vector<64x12xf32>, vector<12x32xf32>, vector<64x32xf32> -> vector<64x32xf32>
    %c0_4 = arith.constant 0 : index
    %c0_5 = arith.constant 0 : index
    %4 = vector.load %arg4[%c0_4, %c0_5] : memref<1x32xf32, #tpu.memory_space<vmem>>, vector<1x32xf32>
    %5 = vector.broadcast %4 : vector<1x32xf32> to vector<64x32xf32>
    %6 = arith.addf %3, %5 : vector<64x32xf32>
    %cst_6 = arith.constant 0.000000e+00 : f32
    %7 = vector.broadcast %cst_6 : f32 to vector<64x32xf32>
    %8 = arith.maximumf %6, %7 : vector<64x32xf32>
    %c0_7 = arith.constant 0 : index
    %c0_8 = arith.constant 0 : index
    %9 = vector.load %arg5[%c0_7, %c0_8] : memref<32x128xf32, #tpu.memory_space<vmem>>, vector<32x128xf32>
    %c0_9 = arith.constant 0 : index
    %c0_10 = arith.constant 0 : index
    %10 = vector.load %arg6[%c0_9, %c0_10] : memref<32x128xf32, #tpu.memory_space<vmem>>, vector<32x128xf32>
    %c0_11 = arith.constant 0 : index
    %c0_12 = arith.constant 0 : index
    %11 = vector.load %arg7[%c0_11, %c0_12] : memref<1x128xf32, #tpu.memory_space<vmem>>, vector<1x128xf32>
    %cst_13 = arith.constant dense<0.000000e+00> : vector<64x128xf32>
    %12 = tpu.matmul %8, %9, %cst_13 {dimension_numbers = #tpu.dot_dimension_numbers<[1], [0], [0], [1], [0, 0, 1, 1], [], []>} : vector<64x32xf32>, vector<32x128xf32>, vector<64x128xf32> -> vector<64x128xf32>
    %13 = vector.broadcast %11 : vector<1x128xf32> to vector<64x128xf32>
    %14 = arith.addf %12, %13 : vector<64x128xf32>
    %cst_14 = arith.constant 0.000000e+00 : f32
    %15 = vector.broadcast %cst_14 : f32 to vector<8x32xf32>
    %cst_15 = arith.constant 0.000000e+00 : f32
    %16 = vector.broadcast %cst_15 : f32 to vector<8x32xf32>
    %17 = vector.shape_cast %14 : vector<64x128xf32> to vector<8x8x128xf32>
    %18 = vector.extract_strided_slice %17 {offsets = [0, 0, 0], sizes = [1, 8, 128], strides = [1, 1, 1]} : vector<8x8x128xf32> to vector<1x8x128xf32>
    %19 = vector.shape_cast %18 : vector<1x8x128xf32> to vector<8x128xf32>
    %cst_16 = arith.constant dense<0.000000e+00> : vector<8x128xf32>
    %20 = tpu.matmul %15, %10, %cst_16 {dimension_numbers = #tpu.dot_dimension_numbers<[1], [0], [0], [1], [0, 0, 1, 1], [], []>} : vector<8x32xf32>, vector<32x128xf32>, vector<8x128xf32> -> vector<8x128xf32>
    %21 = arith.addf %19, %20 : vector<8x128xf32>
    %22 = arith.negf %21 : vector<8x128xf32>
    %23 = math.exp %22 : vector<8x128xf32>
    %cst_17 = arith.constant 1.000000e+00 : f32
    %24 = vector.broadcast %cst_17 : f32 to vector<8x128xf32>
    %25 = arith.addf %24, %23 : vector<8x128xf32>
    %26 = arith.divf %24, %25 : vector<8x128xf32>
    %27 = vector.extract_strided_slice %26 {offsets = [0, 0], sizes = [8, 32], strides = [1, 1]} : vector<8x128xf32> to vector<8x32xf32>
    %28 = vector.extract_strided_slice %26 {offsets = [0, 32], sizes = [8, 32], strides = [1, 1]} : vector<8x128xf32> to vector<8x32xf32>
    %29 = vector.extract_strided_slice %26 {offsets = [0, 64], sizes = [8, 32], strides = [1, 1]} : vector<8x128xf32> to vector<8x32xf32>
    %cst_18 = arith.constant 2.000000e+00 : f32
    %30 = vector.broadcast %cst_18 : f32 to vector<8x32xf32>
    %31 = arith.mulf %30, %29 : vector<8x32xf32>
    %cst_19 = arith.constant 1.000000e+00 : f32
    %32 = vector.broadcast %cst_19 : f32 to vector<8x32xf32>
    %33 = arith.subf %31, %32 : vector<8x32xf32>
    %34 = vector.extract_strided_slice %26 {offsets = [0, 96], sizes = [8, 32], strides = [1, 1]} : vector<8x128xf32> to vector<8x32xf32>
    %35 = arith.mulf %28, %16 : vector<8x32xf32>
    %36 = arith.mulf %27, %33 : vector<8x32xf32>
    %37 = arith.addf %35, %36 : vector<8x32xf32>
    %38 = math.tanh %37 : vector<8x32xf32>
    %39 = arith.mulf %34, %38 : vector<8x32xf32>
    %c0_20 = arith.constant 0 : index
    %c0_21 = arith.constant 0 : index
    %c0_22 = arith.constant 0 : index
    %40 = vector.load %arg17[%c0_20, %c0_21, %c0_22] : memref<8x8x32xf32, #tpu.memory_space<vmem>>, vector<1x8x32xf32>
    %41 = vector.shape_cast %40 : vector<1x8x32xf32> to vector<8x32xf32>
    %42 = vector.shape_cast %39 : vector<8x32xf32> to vector<1x8x32xf32>
    tpu.vector_store %arg17[%c0_20, %c0_21, %c0_22], %42 {strides = array<i32>} : memref<8x8x32xf32, #tpu.memory_space<vmem>>, vector<1x8x32xf32>,
    %43 = vector.extract_strided_slice %17 {offsets = [1, 0, 0], sizes = [1, 8, 128], strides = [1, 1, 1]} : vector<8x8x128xf32> to vector<1x8x128xf32>
    %44 = vector.shape_cast %43 : vector<1x8x128xf32> to vector<8x128xf32>
    %cst_23 = arith.constant dense<0.000000e+00> : vector<8x128xf32>
    %45 = tpu.matmul %39, %10, %cst_23 {dimension_numbers = #tpu.dot_dimension_numbers<[1], [0], [0], [1], [0, 0, 1, 1], [], []>} : vector<8x32xf32>, vector<32x128xf32>, vector<8x128xf32> -> vector<8x128xf32>
    %46 = arith.addf %44, %45 : vector<8x128xf32>
    %47 = arith.negf %46 : vector<8x128xf32>
    %48 = math.exp %47 : vector<8x128xf32>
    %cst_24 = arith.constant 1.000000e+00 : f32
    %49 = vector.broadcast %cst_24 : f32 to vector<8x128xf32>
    %50 = arith.addf %49, %48 : vector<8x128xf32>
    %51 = arith.divf %49, %50 : vector<8x128xf32>
    %52 = vector.extract_strided_slice %51 {offsets = [0, 0], sizes = [8, 32], strides = [1, 1]} : vector<8x128xf32> to vector<8x32xf32>
    %53 = vector.extract_strided_slice %51 {offsets = [0, 32], sizes = [8, 32], strides = [1, 1]} : vector<8x128xf32> to vector<8x32xf32>
    %54 = vector.extract_strided_slice %51 {offsets = [0, 64], sizes = [8, 32], strides = [1, 1]} : vector<8x128xf32> to vector<8x32xf32>
    %cst_25 = arith.constant 2.000000e+00 : f32
    %55 = vector.broadcast %cst_25 : f32 to vector<8x32xf32>
    %56 = arith.mulf %55, %54 : vector<8x32xf32>
    %cst_26 = arith.constant 1.000000e+00 : f32
    %57 = vector.broadcast %cst_26 : f32 to vector<8x32xf32>
    %58 = arith.subf %56, %57 : vector<8x32xf32>
    %59 = vector.extract_strided_slice %51 {offsets = [0, 96], sizes = [8, 32], strides = [1, 1]} : vector<8x128xf32> to vector<8x32xf32>
    %60 = arith.mulf %53, %37 : vector<8x32xf32>
    %61 = arith.mulf %52, %58 : vector<8x32xf32>
    %62 = arith.addf %60, %61 : vector<8x32xf32>
    %63 = math.tanh %62 : vector<8x32xf32>
    %64 = arith.mulf %59, %63 : vector<8x32xf32>
    %c1 = arith.constant 1 : index
    %c0_27 = arith.constant 0 : index
    %c0_28 = arith.constant 0 : index
    %65 = vector.load %arg17[%c1, %c0_27, %c0_28] : memref<8x8x32xf32, #tpu.memory_space<vmem>>, vector<1x8x32xf32>
    %66 = vector.shape_cast %65 : vector<1x8x32xf32> to vector<8x32xf32>
    %67 = vector.shape_cast %64 : vector<8x32xf32> to vector<1x8x32xf32>
    tpu.vector_store %arg17[%c1, %c0_27, %c0_28], %67 {strides = array<i32>} : memref<8x8x32xf32, #tpu.memory_space<vmem>>, vector<1x8x32xf32>,
    %68 = vector.extract_strided_slice %17 {offsets = [2, 0, 0], sizes = [1, 8, 128], strides = [1, 1, 1]} : vector<8x8x128xf32> to vector<1x8x128xf32>
    %69 = vector.shape_cast %68 : vector<1x8x128xf32> to vector<8x128xf32>
    %cst_29 = arith.constant dense<0.000000e+00> : vector<8x128xf32>
    %70 = tpu.matmul %64, %10, %cst_29 {dimension_numbers = #tpu.dot_dimension_numbers<[1], [0], [0], [1], [0, 0, 1, 1], [], []>} : vector<8x32xf32>, vector<32x128xf32>, vector<8x128xf32> -> vector<8x128xf32>
    %71 = arith.addf %69, %70 : vector<8x128xf32>
    %72 = arith.negf %71 : vector<8x128xf32>
    %73 = math.exp %72 : vector<8x128xf32>
    %cst_30 = arith.constant 1.000000e+00 : f32
    %74 = vector.broadcast %cst_30 : f32 to vector<8x128xf32>
    %75 = arith.addf %74, %73 : vector<8x128xf32>
    %76 = arith.divf %74, %75 : vector<8x128xf32>
    %77 = vector.extract_strided_slice %76 {offsets = [0, 0], sizes = [8, 32], strides = [1, 1]} : vector<8x128xf32> to vector<8x32xf32>
    %78 = vector.extract_strided_slice %76 {offsets = [0, 32], sizes = [8, 32], strides = [1, 1]} : vector<8x128xf32> to vector<8x32xf32>
    %79 = vector.extract_strided_slice %76 {offsets = [0, 64], sizes = [8, 32], strides = [1, 1]} : vector<8x128xf32> to vector<8x32xf32>
    %cst_31 = arith.constant 2.000000e+00 : f32
    %80 = vector.broadcast %cst_31 : f32 to vector<8x32xf32>
    %81 = arith.mulf %80, %79 : vector<8x32xf32>
    %cst_32 = arith.constant 1.000000e+00 : f32
    %82 = vector.broadcast %cst_32 : f32 to vector<8x32xf32>
    %83 = arith.subf %81, %82 : vector<8x32xf32>
    %84 = vector.extract_strided_slice %76 {offsets = [0, 96], sizes = [8, 32], strides = [1, 1]} : vector<8x128xf32> to vector<8x32xf32>
    %85 = arith.mulf %78, %62 : vector<8x32xf32>
    %86 = arith.mulf %77, %83 : vector<8x32xf32>
    %87 = arith.addf %85, %86 : vector<8x32xf32>
    %88 = math.tanh %87 : vector<8x32xf32>
    %89 = arith.mulf %84, %88 : vector<8x32xf32>
    %c2 = arith.constant 2 : index
    %c0_33 = arith.constant 0 : index
    %c0_34 = arith.constant 0 : index
    %90 = vector.load %arg17[%c2, %c0_33, %c0_34] : memref<8x8x32xf32, #tpu.memory_space<vmem>>, vector<1x8x32xf32>
    %91 = vector.shape_cast %90 : vector<1x8x32xf32> to vector<8x32xf32>
    %92 = vector.shape_cast %89 : vector<8x32xf32> to vector<1x8x32xf32>
    tpu.vector_store %arg17[%c2, %c0_33, %c0_34], %92 {strides = array<i32>} : memref<8x8x32xf32, #tpu.memory_space<vmem>>, vector<1x8x32xf32>,
    %93 = vector.extract_strided_slice %17 {offsets = [3, 0, 0], sizes = [1, 8, 128], strides = [1, 1, 1]} : vector<8x8x128xf32> to vector<1x8x128xf32>
    %94 = vector.shape_cast %93 : vector<1x8x128xf32> to vector<8x128xf32>
    %cst_35 = arith.constant dense<0.000000e+00> : vector<8x128xf32>
    %95 = tpu.matmul %89, %10, %cst_35 {dimension_numbers = #tpu.dot_dimension_numbers<[1], [0], [0], [1], [0, 0, 1, 1], [], []>} : vector<8x32xf32>, vector<32x128xf32>, vector<8x128xf32> -> vector<8x128xf32>
    %96 = arith.addf %94, %95 : vector<8x128xf32>
    %97 = arith.negf %96 : vector<8x128xf32>
    %98 = math.exp %97 : vector<8x128xf32>
    %cst_36 = arith.constant 1.000000e+00 : f32
    %99 = vector.broadcast %cst_36 : f32 to vector<8x128xf32>
    %100 = arith.addf %99, %98 : vector<8x128xf32>
    %101 = arith.divf %99, %100 : vector<8x128xf32>
    %102 = vector.extract_strided_slice %101 {offsets = [0, 0], sizes = [8, 32], strides = [1, 1]} : vector<8x128xf32> to vector<8x32xf32>
    %103 = vector.extract_strided_slice %101 {offsets = [0, 32], sizes = [8, 32], strides = [1, 1]} : vector<8x128xf32> to vector<8x32xf32>
    %104 = vector.extract_strided_slice %101 {offsets = [0, 64], sizes = [8, 32], strides = [1, 1]} : vector<8x128xf32> to vector<8x32xf32>
    %cst_37 = arith.constant 2.000000e+00 : f32
    %105 = vector.broadcast %cst_37 : f32 to vector<8x32xf32>
    %106 = arith.mulf %105, %104 : vector<8x32xf32>
    %cst_38 = arith.constant 1.000000e+00 : f32
    %107 = vector.broadcast %cst_38 : f32 to vector<8x32xf32>
    %108 = arith.subf %106, %107 : vector<8x32xf32>
    %109 = vector.extract_strided_slice %101 {offsets = [0, 96], sizes = [8, 32], strides = [1, 1]} : vector<8x128xf32> to vector<8x32xf32>
    %110 = arith.mulf %103, %87 : vector<8x32xf32>
    %111 = arith.mulf %102, %108 : vector<8x32xf32>
    %112 = arith.addf %110, %111 : vector<8x32xf32>
    %113 = math.tanh %112 : vector<8x32xf32>
    %114 = arith.mulf %109, %113 : vector<8x32xf32>
    %c3 = arith.constant 3 : index
    %c0_39 = arith.constant 0 : index
    %c0_40 = arith.constant 0 : index
    %115 = vector.load %arg17[%c3, %c0_39, %c0_40] : memref<8x8x32xf32, #tpu.memory_space<vmem>>, vector<1x8x32xf32>
    %116 = vector.shape_cast %115 : vector<1x8x32xf32> to vector<8x32xf32>
    %117 = vector.shape_cast %114 : vector<8x32xf32> to vector<1x8x32xf32>
    tpu.vector_store %arg17[%c3, %c0_39, %c0_40], %117 {strides = array<i32>} : memref<8x8x32xf32, #tpu.memory_space<vmem>>, vector<1x8x32xf32>,
    %118 = vector.extract_strided_slice %17 {offsets = [4, 0, 0], sizes = [1, 8, 128], strides = [1, 1, 1]} : vector<8x8x128xf32> to vector<1x8x128xf32>
    %119 = vector.shape_cast %118 : vector<1x8x128xf32> to vector<8x128xf32>
    %cst_41 = arith.constant dense<0.000000e+00> : vector<8x128xf32>
    %120 = tpu.matmul %114, %10, %cst_41 {dimension_numbers = #tpu.dot_dimension_numbers<[1], [0], [0], [1], [0, 0, 1, 1], [], []>} : vector<8x32xf32>, vector<32x128xf32>, vector<8x128xf32> -> vector<8x128xf32>
    %121 = arith.addf %119, %120 : vector<8x128xf32>
    %122 = arith.negf %121 : vector<8x128xf32>
    %123 = math.exp %122 : vector<8x128xf32>
    %cst_42 = arith.constant 1.000000e+00 : f32
    %124 = vector.broadcast %cst_42 : f32 to vector<8x128xf32>
    %125 = arith.addf %124, %123 : vector<8x128xf32>
    %126 = arith.divf %124, %125 : vector<8x128xf32>
    %127 = vector.extract_strided_slice %126 {offsets = [0, 0], sizes = [8, 32], strides = [1, 1]} : vector<8x128xf32> to vector<8x32xf32>
    %128 = vector.extract_strided_slice %126 {offsets = [0, 32], sizes = [8, 32], strides = [1, 1]} : vector<8x128xf32> to vector<8x32xf32>
    %129 = vector.extract_strided_slice %126 {offsets = [0, 64], sizes = [8, 32], strides = [1, 1]} : vector<8x128xf32> to vector<8x32xf32>
    %cst_43 = arith.constant 2.000000e+00 : f32
    %130 = vector.broadcast %cst_43 : f32 to vector<8x32xf32>
    %131 = arith.mulf %130, %129 : vector<8x32xf32>
    %cst_44 = arith.constant 1.000000e+00 : f32
    %132 = vector.broadcast %cst_44 : f32 to vector<8x32xf32>
    %133 = arith.subf %131, %132 : vector<8x32xf32>
    %134 = vector.extract_strided_slice %126 {offsets = [0, 96], sizes = [8, 32], strides = [1, 1]} : vector<8x128xf32> to vector<8x32xf32>
    %135 = arith.mulf %128, %112 : vector<8x32xf32>
    %136 = arith.mulf %127, %133 : vector<8x32xf32>
    %137 = arith.addf %135, %136 : vector<8x32xf32>
    %138 = math.tanh %137 : vector<8x32xf32>
    %139 = arith.mulf %134, %138 : vector<8x32xf32>
    %c4 = arith.constant 4 : index
    %c0_45 = arith.constant 0 : index
    %c0_46 = arith.constant 0 : index
    %140 = vector.load %arg17[%c4, %c0_45, %c0_46] : memref<8x8x32xf32, #tpu.memory_space<vmem>>, vector<1x8x32xf32>
    %141 = vector.shape_cast %140 : vector<1x8x32xf32> to vector<8x32xf32>
    %142 = vector.shape_cast %139 : vector<8x32xf32> to vector<1x8x32xf32>
    tpu.vector_store %arg17[%c4, %c0_45, %c0_46], %142 {strides = array<i32>} : memref<8x8x32xf32, #tpu.memory_space<vmem>>, vector<1x8x32xf32>,
    %143 = vector.extract_strided_slice %17 {offsets = [5, 0, 0], sizes = [1, 8, 128], strides = [1, 1, 1]} : vector<8x8x128xf32> to vector<1x8x128xf32>
    %144 = vector.shape_cast %143 : vector<1x8x128xf32> to vector<8x128xf32>
    %cst_47 = arith.constant dense<0.000000e+00> : vector<8x128xf32>
    %145 = tpu.matmul %139, %10, %cst_47 {dimension_numbers = #tpu.dot_dimension_numbers<[1], [0], [0], [1], [0, 0, 1, 1], [], []>} : vector<8x32xf32>, vector<32x128xf32>, vector<8x128xf32> -> vector<8x128xf32>
    %146 = arith.addf %144, %145 : vector<8x128xf32>
    %147 = arith.negf %146 : vector<8x128xf32>
    %148 = math.exp %147 : vector<8x128xf32>
    %cst_48 = arith.constant 1.000000e+00 : f32
    %149 = vector.broadcast %cst_48 : f32 to vector<8x128xf32>
    %150 = arith.addf %149, %148 : vector<8x128xf32>
    %151 = arith.divf %149, %150 : vector<8x128xf32>
    %152 = vector.extract_strided_slice %151 {offsets = [0, 0], sizes = [8, 32], strides = [1, 1]} : vector<8x128xf32> to vector<8x32xf32>
    %153 = vector.extract_strided_slice %151 {offsets = [0, 32], sizes = [8, 32], strides = [1, 1]} : vector<8x128xf32> to vector<8x32xf32>
    %154 = vector.extract_strided_slice %151 {offsets = [0, 64], sizes = [8, 32], strides = [1, 1]} : vector<8x128xf32> to vector<8x32xf32>
    %cst_49 = arith.constant 2.000000e+00 : f32
    %155 = vector.broadcast %cst_49 : f32 to vector<8x32xf32>
    %156 = arith.mulf %155, %154 : vector<8x32xf32>
    %cst_50 = arith.constant 1.000000e+00 : f32
    %157 = vector.broadcast %cst_50 : f32 to vector<8x32xf32>
    %158 = arith.subf %156, %157 : vector<8x32xf32>
    %159 = vector.extract_strided_slice %151 {offsets = [0, 96], sizes = [8, 32], strides = [1, 1]} : vector<8x128xf32> to vector<8x32xf32>
    %160 = arith.mulf %153, %137 : vector<8x32xf32>
    %161 = arith.mulf %152, %158 : vector<8x32xf32>
    %162 = arith.addf %160, %161 : vector<8x32xf32>
    %163 = math.tanh %162 : vector<8x32xf32>
    %164 = arith.mulf %159, %163 : vector<8x32xf32>
    %c5 = arith.constant 5 : index
    %c0_51 = arith.constant 0 : index
    %c0_52 = arith.constant 0 : index
    %165 = vector.load %arg17[%c5, %c0_51, %c0_52] : memref<8x8x32xf32, #tpu.memory_space<vmem>>, vector<1x8x32xf32>
    %166 = vector.shape_cast %165 : vector<1x8x32xf32> to vector<8x32xf32>
    %167 = vector.shape_cast %164 : vector<8x32xf32> to vector<1x8x32xf32>
    tpu.vector_store %arg17[%c5, %c0_51, %c0_52], %167 {strides = array<i32>} : memref<8x8x32xf32, #tpu.memory_space<vmem>>, vector<1x8x32xf32>,
    %168 = vector.extract_strided_slice %17 {offsets = [6, 0, 0], sizes = [1, 8, 128], strides = [1, 1, 1]} : vector<8x8x128xf32> to vector<1x8x128xf32>
    %169 = vector.shape_cast %168 : vector<1x8x128xf32> to vector<8x128xf32>
    %cst_53 = arith.constant dense<0.000000e+00> : vector<8x128xf32>
    %170 = tpu.matmul %164, %10, %cst_53 {dimension_numbers = #tpu.dot_dimension_numbers<[1], [0], [0], [1], [0, 0, 1, 1], [], []>} : vector<8x32xf32>, vector<32x128xf32>, vector<8x128xf32> -> vector<8x128xf32>
    %171 = arith.addf %169, %170 : vector<8x128xf32>
    %172 = arith.negf %171 : vector<8x128xf32>
    %173 = math.exp %172 : vector<8x128xf32>
    %cst_54 = arith.constant 1.000000e+00 : f32
    %174 = vector.broadcast %cst_54 : f32 to vector<8x128xf32>
    %175 = arith.addf %174, %173 : vector<8x128xf32>
    %176 = arith.divf %174, %175 : vector<8x128xf32>
    %177 = vector.extract_strided_slice %176 {offsets = [0, 0], sizes = [8, 32], strides = [1, 1]} : vector<8x128xf32> to vector<8x32xf32>
    %178 = vector.extract_strided_slice %176 {offsets = [0, 32], sizes = [8, 32], strides = [1, 1]} : vector<8x128xf32> to vector<8x32xf32>
    %179 = vector.extract_strided_slice %176 {offsets = [0, 64], sizes = [8, 32], strides = [1, 1]} : vector<8x128xf32> to vector<8x32xf32>
    %cst_55 = arith.constant 2.000000e+00 : f32
    %180 = vector.broadcast %cst_55 : f32 to vector<8x32xf32>
    %181 = arith.mulf %180, %179 : vector<8x32xf32>
    %cst_56 = arith.constant 1.000000e+00 : f32
    %182 = vector.broadcast %cst_56 : f32 to vector<8x32xf32>
    %183 = arith.subf %181, %182 : vector<8x32xf32>
    %184 = vector.extract_strided_slice %176 {offsets = [0, 96], sizes = [8, 32], strides = [1, 1]} : vector<8x128xf32> to vector<8x32xf32>
    %185 = arith.mulf %178, %162 : vector<8x32xf32>
    %186 = arith.mulf %177, %183 : vector<8x32xf32>
    %187 = arith.addf %185, %186 : vector<8x32xf32>
    %188 = math.tanh %187 : vector<8x32xf32>
    %189 = arith.mulf %184, %188 : vector<8x32xf32>
    %c6 = arith.constant 6 : index
    %c0_57 = arith.constant 0 : index
    %c0_58 = arith.constant 0 : index
    %190 = vector.load %arg17[%c6, %c0_57, %c0_58] : memref<8x8x32xf32, #tpu.memory_space<vmem>>, vector<1x8x32xf32>
    %191 = vector.shape_cast %190 : vector<1x8x32xf32> to vector<8x32xf32>
    %192 = vector.shape_cast %189 : vector<8x32xf32> to vector<1x8x32xf32>
    tpu.vector_store %arg17[%c6, %c0_57, %c0_58], %192 {strides = array<i32>} : memref<8x8x32xf32, #tpu.memory_space<vmem>>, vector<1x8x32xf32>,
    %193 = vector.extract_strided_slice %17 {offsets = [7, 0, 0], sizes = [1, 8, 128], strides = [1, 1, 1]} : vector<8x8x128xf32> to vector<1x8x128xf32>
    %194 = vector.shape_cast %193 : vector<1x8x128xf32> to vector<8x128xf32>
    %cst_59 = arith.constant dense<0.000000e+00> : vector<8x128xf32>
    %195 = tpu.matmul %189, %10, %cst_59 {dimension_numbers = #tpu.dot_dimension_numbers<[1], [0], [0], [1], [0, 0, 1, 1], [], []>} : vector<8x32xf32>, vector<32x128xf32>, vector<8x128xf32> -> vector<8x128xf32>
    %196 = arith.addf %194, %195 : vector<8x128xf32>
    %197 = arith.negf %196 : vector<8x128xf32>
    %198 = math.exp %197 : vector<8x128xf32>
    %cst_60 = arith.constant 1.000000e+00 : f32
    %199 = vector.broadcast %cst_60 : f32 to vector<8x128xf32>
    %200 = arith.addf %199, %198 : vector<8x128xf32>
    %201 = arith.divf %199, %200 : vector<8x128xf32>
    %202 = vector.extract_strided_slice %201 {offsets = [0, 0], sizes = [8, 32], strides = [1, 1]} : vector<8x128xf32> to vector<8x32xf32>
    %203 = vector.extract_strided_slice %201 {offsets = [0, 32], sizes = [8, 32], strides = [1, 1]} : vector<8x128xf32> to vector<8x32xf32>
    %204 = vector.extract_strided_slice %201 {offsets = [0, 64], sizes = [8, 32], strides = [1, 1]} : vector<8x128xf32> to vector<8x32xf32>
    %cst_61 = arith.constant 2.000000e+00 : f32
    %205 = vector.broadcast %cst_61 : f32 to vector<8x32xf32>
    %206 = arith.mulf %205, %204 : vector<8x32xf32>
    %cst_62 = arith.constant 1.000000e+00 : f32
    %207 = vector.broadcast %cst_62 : f32 to vector<8x32xf32>
    %208 = arith.subf %206, %207 : vector<8x32xf32>
    %209 = vector.extract_strided_slice %201 {offsets = [0, 96], sizes = [8, 32], strides = [1, 1]} : vector<8x128xf32> to vector<8x32xf32>
    %210 = arith.mulf %203, %187 : vector<8x32xf32>
    %211 = arith.mulf %202, %208 : vector<8x32xf32>
    %212 = arith.addf %210, %211 : vector<8x32xf32>
    %213 = math.tanh %212 : vector<8x32xf32>
    %214 = arith.mulf %209, %213 : vector<8x32xf32>
    %c7 = arith.constant 7 : index
    %c0_63 = arith.constant 0 : index
    %c0_64 = arith.constant 0 : index
    %215 = vector.load %arg17[%c7, %c0_63, %c0_64] : memref<8x8x32xf32, #tpu.memory_space<vmem>>, vector<1x8x32xf32>
    %216 = vector.shape_cast %215 : vector<1x8x32xf32> to vector<8x32xf32>
    %217 = vector.shape_cast %214 : vector<8x32xf32> to vector<1x8x32xf32>
    tpu.vector_store %arg17[%c7, %c0_63, %c0_64], %217 {strides = array<i32>} : memref<8x8x32xf32, #tpu.memory_space<vmem>>, vector<1x8x32xf32>,
    %c0_65 = arith.constant 0 : index
    %c0_66 = arith.constant 0 : index
    %c0_67 = arith.constant 0 : index
    %218 = vector.load %arg17[%c0_65, %c0_66, %c0_67] : memref<8x8x32xf32, #tpu.memory_space<vmem>>, vector<8x8x32xf32>
    %219 = vector.shape_cast %218 : vector<8x8x32xf32> to vector<64x32xf32>
    %c0_68 = arith.constant 0 : index
    %c0_69 = arith.constant 0 : index
    %220 = vector.load %arg8[%c0_68, %c0_69] : memref<32x128xf32, #tpu.memory_space<vmem>>, vector<32x128xf32>
    %c0_70 = arith.constant 0 : index
    %c0_71 = arith.constant 0 : index
    %221 = vector.load %arg9[%c0_70, %c0_71] : memref<32x128xf32, #tpu.memory_space<vmem>>, vector<32x128xf32>
    %c0_72 = arith.constant 0 : index
    %c0_73 = arith.constant 0 : index
    %222 = vector.load %arg10[%c0_72, %c0_73] : memref<1x128xf32, #tpu.memory_space<vmem>>, vector<1x128xf32>
    %cst_74 = arith.constant dense<0.000000e+00> : vector<64x128xf32>
    %223 = tpu.matmul %219, %220, %cst_74 {dimension_numbers = #tpu.dot_dimension_numbers<[1], [0], [0], [1], [0, 0, 1, 1], [], []>} : vector<64x32xf32>, vector<32x128xf32>, vector<64x128xf32> -> vector<64x128xf32>
    %224 = vector.broadcast %222 : vector<1x128xf32> to vector<64x128xf32>
    %225 = arith.addf %223, %224 : vector<64x128xf32>
    %cst_75 = arith.constant 0.000000e+00 : f32
    %226 = vector.broadcast %cst_75 : f32 to vector<8x32xf32>
    %cst_76 = arith.constant 0.000000e+00 : f32
    %227 = vector.broadcast %cst_76 : f32 to vector<8x32xf32>
    %228 = vector.shape_cast %225 : vector<64x128xf32> to vector<8x8x128xf32>
    %229 = vector.extract_strided_slice %228 {offsets = [0, 0, 0], sizes = [1, 8, 128], strides = [1, 1, 1]} : vector<8x8x128xf32> to vector<1x8x128xf32>
    %230 = vector.shape_cast %229 : vector<1x8x128xf32> to vector<8x128xf32>
    %cst_77 = arith.constant dense<0.000000e+00> : vector<8x128xf32>
    %231 = tpu.matmul %226, %221, %cst_77 {dimension_numbers = #tpu.dot_dimension_numbers<[1], [0], [0], [1], [0, 0, 1, 1], [], []>} : vector<8x32xf32>, vector<32x128xf32>, vector<8x128xf32> -> vector<8x128xf32>
    %232 = arith.addf %230, %231 : vector<8x128xf32>
    %233 = arith.negf %232 : vector<8x128xf32>
    %234 = math.exp %233 : vector<8x128xf32>
    %cst_78 = arith.constant 1.000000e+00 : f32
    %235 = vector.broadcast %cst_78 : f32 to vector<8x128xf32>
    %236 = arith.addf %235, %234 : vector<8x128xf32>
    %237 = arith.divf %235, %236 : vector<8x128xf32>
    %238 = vector.extract_strided_slice %237 {offsets = [0, 0], sizes = [8, 32], strides = [1, 1]} : vector<8x128xf32> to vector<8x32xf32>
    %239 = vector.extract_strided_slice %237 {offsets = [0, 32], sizes = [8, 32], strides = [1, 1]} : vector<8x128xf32> to vector<8x32xf32>
    %240 = vector.extract_strided_slice %237 {offsets = [0, 64], sizes = [8, 32], strides = [1, 1]} : vector<8x128xf32> to vector<8x32xf32>
    %cst_79 = arith.constant 2.000000e+00 : f32
    %241 = vector.broadcast %cst_79 : f32 to vector<8x32xf32>
    %242 = arith.mulf %241, %240 : vector<8x32xf32>
    %cst_80 = arith.constant 1.000000e+00 : f32
    %243 = vector.broadcast %cst_80 : f32 to vector<8x32xf32>
    %244 = arith.subf %242, %243 : vector<8x32xf32>
    %245 = vector.extract_strided_slice %237 {offsets = [0, 96], sizes = [8, 32], strides = [1, 1]} : vector<8x128xf32> to vector<8x32xf32>
    %246 = arith.mulf %239, %227 : vector<8x32xf32>
    %247 = arith.mulf %238, %244 : vector<8x32xf32>
    %248 = arith.addf %246, %247 : vector<8x32xf32>
    %249 = math.tanh %248 : vector<8x32xf32>
    %250 = arith.mulf %245, %249 : vector<8x32xf32>
    %251 = vector.extract_strided_slice %228 {offsets = [1, 0, 0], sizes = [1, 8, 128], strides = [1, 1, 1]} : vector<8x8x128xf32> to vector<1x8x128xf32>
    %252 = vector.shape_cast %251 : vector<1x8x128xf32> to vector<8x128xf32>
    %cst_81 = arith.constant dense<0.000000e+00> : vector<8x128xf32>
    %253 = tpu.matmul %250, %221, %cst_81 {dimension_numbers = #tpu.dot_dimension_numbers<[1], [0], [0], [1], [0, 0, 1, 1], [], []>} : vector<8x32xf32>, vector<32x128xf32>, vector<8x128xf32> -> vector<8x128xf32>
    %254 = arith.addf %252, %253 : vector<8x128xf32>
    %255 = arith.negf %254 : vector<8x128xf32>
    %256 = math.exp %255 : vector<8x128xf32>
    %cst_82 = arith.constant 1.000000e+00 : f32
    %257 = vector.broadcast %cst_82 : f32 to vector<8x128xf32>
    %258 = arith.addf %257, %256 : vector<8x128xf32>
    %259 = arith.divf %257, %258 : vector<8x128xf32>
    %260 = vector.extract_strided_slice %259 {offsets = [0, 0], sizes = [8, 32], strides = [1, 1]} : vector<8x128xf32> to vector<8x32xf32>
    %261 = vector.extract_strided_slice %259 {offsets = [0, 32], sizes = [8, 32], strides = [1, 1]} : vector<8x128xf32> to vector<8x32xf32>
    %262 = vector.extract_strided_slice %259 {offsets = [0, 64], sizes = [8, 32], strides = [1, 1]} : vector<8x128xf32> to vector<8x32xf32>
    %cst_83 = arith.constant 2.000000e+00 : f32
    %263 = vector.broadcast %cst_83 : f32 to vector<8x32xf32>
    %264 = arith.mulf %263, %262 : vector<8x32xf32>
    %cst_84 = arith.constant 1.000000e+00 : f32
    %265 = vector.broadcast %cst_84 : f32 to vector<8x32xf32>
    %266 = arith.subf %264, %265 : vector<8x32xf32>
    %267 = vector.extract_strided_slice %259 {offsets = [0, 96], sizes = [8, 32], strides = [1, 1]} : vector<8x128xf32> to vector<8x32xf32>
    %268 = arith.mulf %261, %248 : vector<8x32xf32>
    %269 = arith.mulf %260, %266 : vector<8x32xf32>
    %270 = arith.addf %268, %269 : vector<8x32xf32>
    %271 = math.tanh %270 : vector<8x32xf32>
    %272 = arith.mulf %267, %271 : vector<8x32xf32>
    %273 = vector.extract_strided_slice %228 {offsets = [2, 0, 0], sizes = [1, 8, 128], strides = [1, 1, 1]} : vector<8x8x128xf32> to vector<1x8x128xf32>
    %274 = vector.shape_cast %273 : vector<1x8x128xf32> to vector<8x128xf32>
    %cst_85 = arith.constant dense<0.000000e+00> : vector<8x128xf32>
    %275 = tpu.matmul %272, %221, %cst_85 {dimension_numbers = #tpu.dot_dimension_numbers<[1], [0], [0], [1], [0, 0, 1, 1], [], []>} : vector<8x32xf32>, vector<32x128xf32>, vector<8x128xf32> -> vector<8x128xf32>
    %276 = arith.addf %274, %275 : vector<8x128xf32>
    %277 = arith.negf %276 : vector<8x128xf32>
    %278 = math.exp %277 : vector<8x128xf32>
    %cst_86 = arith.constant 1.000000e+00 : f32
    %279 = vector.broadcast %cst_86 : f32 to vector<8x128xf32>
    %280 = arith.addf %279, %278 : vector<8x128xf32>
    %281 = arith.divf %279, %280 : vector<8x128xf32>
    %282 = vector.extract_strided_slice %281 {offsets = [0, 0], sizes = [8, 32], strides = [1, 1]} : vector<8x128xf32> to vector<8x32xf32>
    %283 = vector.extract_strided_slice %281 {offsets = [0, 32], sizes = [8, 32], strides = [1, 1]} : vector<8x128xf32> to vector<8x32xf32>
    %284 = vector.extract_strided_slice %281 {offsets = [0, 64], sizes = [8, 32], strides = [1, 1]} : vector<8x128xf32> to vector<8x32xf32>
    %cst_87 = arith.constant 2.000000e+00 : f32
    %285 = vector.broadcast %cst_87 : f32 to vector<8x32xf32>
    %286 = arith.mulf %285, %284 : vector<8x32xf32>
    %cst_88 = arith.constant 1.000000e+00 : f32
    %287 = vector.broadcast %cst_88 : f32 to vector<8x32xf32>
    %288 = arith.subf %286, %287 : vector<8x32xf32>
    %289 = vector.extract_strided_slice %281 {offsets = [0, 96], sizes = [8, 32], strides = [1, 1]} : vector<8x128xf32> to vector<8x32xf32>
    %290 = arith.mulf %283, %270 : vector<8x32xf32>
    %291 = arith.mulf %282, %288 : vector<8x32xf32>
    %292 = arith.addf %290, %291 : vector<8x32xf32>
    %293 = math.tanh %292 : vector<8x32xf32>
    %294 = arith.mulf %289, %293 : vector<8x32xf32>
    %295 = vector.extract_strided_slice %228 {offsets = [3, 0, 0], sizes = [1, 8, 128], strides = [1, 1, 1]} : vector<8x8x128xf32> to vector<1x8x128xf32>
    %296 = vector.shape_cast %295 : vector<1x8x128xf32> to vector<8x128xf32>
    %cst_89 = arith.constant dense<0.000000e+00> : vector<8x128xf32>
    %297 = tpu.matmul %294, %221, %cst_89 {dimension_numbers = #tpu.dot_dimension_numbers<[1], [0], [0], [1], [0, 0, 1, 1], [], []>} : vector<8x32xf32>, vector<32x128xf32>, vector<8x128xf32> -> vector<8x128xf32>
    %298 = arith.addf %296, %297 : vector<8x128xf32>
    %299 = arith.negf %298 : vector<8x128xf32>
    %300 = math.exp %299 : vector<8x128xf32>
    %cst_90 = arith.constant 1.000000e+00 : f32
    %301 = vector.broadcast %cst_90 : f32 to vector<8x128xf32>
    %302 = arith.addf %301, %300 : vector<8x128xf32>
    %303 = arith.divf %301, %302 : vector<8x128xf32>
    %304 = vector.extract_strided_slice %303 {offsets = [0, 0], sizes = [8, 32], strides = [1, 1]} : vector<8x128xf32> to vector<8x32xf32>
    %305 = vector.extract_strided_slice %303 {offsets = [0, 32], sizes = [8, 32], strides = [1, 1]} : vector<8x128xf32> to vector<8x32xf32>
    %306 = vector.extract_strided_slice %303 {offsets = [0, 64], sizes = [8, 32], strides = [1, 1]} : vector<8x128xf32> to vector<8x32xf32>
    %cst_91 = arith.constant 2.000000e+00 : f32
    %307 = vector.broadcast %cst_91 : f32 to vector<8x32xf32>
    %308 = arith.mulf %307, %306 : vector<8x32xf32>
    %cst_92 = arith.constant 1.000000e+00 : f32
    %309 = vector.broadcast %cst_92 : f32 to vector<8x32xf32>
    %310 = arith.subf %308, %309 : vector<8x32xf32>
    %311 = vector.extract_strided_slice %303 {offsets = [0, 96], sizes = [8, 32], strides = [1, 1]} : vector<8x128xf32> to vector<8x32xf32>
    %312 = arith.mulf %305, %292 : vector<8x32xf32>
    %313 = arith.mulf %304, %310 : vector<8x32xf32>
    %314 = arith.addf %312, %313 : vector<8x32xf32>
    %315 = math.tanh %314 : vector<8x32xf32>
    %316 = arith.mulf %311, %315 : vector<8x32xf32>
    %317 = vector.extract_strided_slice %228 {offsets = [4, 0, 0], sizes = [1, 8, 128], strides = [1, 1, 1]} : vector<8x8x128xf32> to vector<1x8x128xf32>
    %318 = vector.shape_cast %317 : vector<1x8x128xf32> to vector<8x128xf32>
    %cst_93 = arith.constant dense<0.000000e+00> : vector<8x128xf32>
    %319 = tpu.matmul %316, %221, %cst_93 {dimension_numbers = #tpu.dot_dimension_numbers<[1], [0], [0], [1], [0, 0, 1, 1], [], []>} : vector<8x32xf32>, vector<32x128xf32>, vector<8x128xf32> -> vector<8x128xf32>
    %320 = arith.addf %318, %319 : vector<8x128xf32>
    %321 = arith.negf %320 : vector<8x128xf32>
    %322 = math.exp %321 : vector<8x128xf32>
    %cst_94 = arith.constant 1.000000e+00 : f32
    %323 = vector.broadcast %cst_94 : f32 to vector<8x128xf32>
    %324 = arith.addf %323, %322 : vector<8x128xf32>
    %325 = arith.divf %323, %324 : vector<8x128xf32>
    %326 = vector.extract_strided_slice %325 {offsets = [0, 0], sizes = [8, 32], strides = [1, 1]} : vector<8x128xf32> to vector<8x32xf32>
    %327 = vector.extract_strided_slice %325 {offsets = [0, 32], sizes = [8, 32], strides = [1, 1]} : vector<8x128xf32> to vector<8x32xf32>
    %328 = vector.extract_strided_slice %325 {offsets = [0, 64], sizes = [8, 32], strides = [1, 1]} : vector<8x128xf32> to vector<8x32xf32>
    %cst_95 = arith.constant 2.000000e+00 : f32
    %329 = vector.broadcast %cst_95 : f32 to vector<8x32xf32>
    %330 = arith.mulf %329, %328 : vector<8x32xf32>
    %cst_96 = arith.constant 1.000000e+00 : f32
    %331 = vector.broadcast %cst_96 : f32 to vector<8x32xf32>
    %332 = arith.subf %330, %331 : vector<8x32xf32>
    %333 = vector.extract_strided_slice %325 {offsets = [0, 96], sizes = [8, 32], strides = [1, 1]} : vector<8x128xf32> to vector<8x32xf32>
    %334 = arith.mulf %327, %314 : vector<8x32xf32>
    %335 = arith.mulf %326, %332 : vector<8x32xf32>
    %336 = arith.addf %334, %335 : vector<8x32xf32>
    %337 = math.tanh %336 : vector<8x32xf32>
    %338 = arith.mulf %333, %337 : vector<8x32xf32>
    %339 = vector.extract_strided_slice %228 {offsets = [5, 0, 0], sizes = [1, 8, 128], strides = [1, 1, 1]} : vector<8x8x128xf32> to vector<1x8x128xf32>
    %340 = vector.shape_cast %339 : vector<1x8x128xf32> to vector<8x128xf32>
    %cst_97 = arith.constant dense<0.000000e+00> : vector<8x128xf32>
    %341 = tpu.matmul %338, %221, %cst_97 {dimension_numbers = #tpu.dot_dimension_numbers<[1], [0], [0], [1], [0, 0, 1, 1], [], []>} : vector<8x32xf32>, vector<32x128xf32>, vector<8x128xf32> -> vector<8x128xf32>
    %342 = arith.addf %340, %341 : vector<8x128xf32>
    %343 = arith.negf %342 : vector<8x128xf32>
    %344 = math.exp %343 : vector<8x128xf32>
    %cst_98 = arith.constant 1.000000e+00 : f32
    %345 = vector.broadcast %cst_98 : f32 to vector<8x128xf32>
    %346 = arith.addf %345, %344 : vector<8x128xf32>
    %347 = arith.divf %345, %346 : vector<8x128xf32>
    %348 = vector.extract_strided_slice %347 {offsets = [0, 0], sizes = [8, 32], strides = [1, 1]} : vector<8x128xf32> to vector<8x32xf32>
    %349 = vector.extract_strided_slice %347 {offsets = [0, 32], sizes = [8, 32], strides = [1, 1]} : vector<8x128xf32> to vector<8x32xf32>
    %350 = vector.extract_strided_slice %347 {offsets = [0, 64], sizes = [8, 32], strides = [1, 1]} : vector<8x128xf32> to vector<8x32xf32>
    %cst_99 = arith.constant 2.000000e+00 : f32
    %351 = vector.broadcast %cst_99 : f32 to vector<8x32xf32>
    %352 = arith.mulf %351, %350 : vector<8x32xf32>
    %cst_100 = arith.constant 1.000000e+00 : f32
    %353 = vector.broadcast %cst_100 : f32 to vector<8x32xf32>
    %354 = arith.subf %352, %353 : vector<8x32xf32>
    %355 = vector.extract_strided_slice %347 {offsets = [0, 96], sizes = [8, 32], strides = [1, 1]} : vector<8x128xf32> to vector<8x32xf32>
    %356 = arith.mulf %349, %336 : vector<8x32xf32>
    %357 = arith.mulf %348, %354 : vector<8x32xf32>
    %358 = arith.addf %356, %357 : vector<8x32xf32>
    %359 = math.tanh %358 : vector<8x32xf32>
    %360 = arith.mulf %355, %359 : vector<8x32xf32>
    %361 = vector.extract_strided_slice %228 {offsets = [6, 0, 0], sizes = [1, 8, 128], strides = [1, 1, 1]} : vector<8x8x128xf32> to vector<1x8x128xf32>
    %362 = vector.shape_cast %361 : vector<1x8x128xf32> to vector<8x128xf32>
    %cst_101 = arith.constant dense<0.000000e+00> : vector<8x128xf32>
    %363 = tpu.matmul %360, %221, %cst_101 {dimension_numbers = #tpu.dot_dimension_numbers<[1], [0], [0], [1], [0, 0, 1, 1], [], []>} : vector<8x32xf32>, vector<32x128xf32>, vector<8x128xf32> -> vector<8x128xf32>
    %364 = arith.addf %362, %363 : vector<8x128xf32>
    %365 = arith.negf %364 : vector<8x128xf32>
    %366 = math.exp %365 : vector<8x128xf32>
    %cst_102 = arith.constant 1.000000e+00 : f32
    %367 = vector.broadcast %cst_102 : f32 to vector<8x128xf32>
    %368 = arith.addf %367, %366 : vector<8x128xf32>
    %369 = arith.divf %367, %368 : vector<8x128xf32>
    %370 = vector.extract_strided_slice %369 {offsets = [0, 0], sizes = [8, 32], strides = [1, 1]} : vector<8x128xf32> to vector<8x32xf32>
    %371 = vector.extract_strided_slice %369 {offsets = [0, 32], sizes = [8, 32], strides = [1, 1]} : vector<8x128xf32> to vector<8x32xf32>
    %372 = vector.extract_strided_slice %369 {offsets = [0, 64], sizes = [8, 32], strides = [1, 1]} : vector<8x128xf32> to vector<8x32xf32>
    %cst_103 = arith.constant 2.000000e+00 : f32
    %373 = vector.broadcast %cst_103 : f32 to vector<8x32xf32>
    %374 = arith.mulf %373, %372 : vector<8x32xf32>
    %cst_104 = arith.constant 1.000000e+00 : f32
    %375 = vector.broadcast %cst_104 : f32 to vector<8x32xf32>
    %376 = arith.subf %374, %375 : vector<8x32xf32>
    %377 = vector.extract_strided_slice %369 {offsets = [0, 96], sizes = [8, 32], strides = [1, 1]} : vector<8x128xf32> to vector<8x32xf32>
    %378 = arith.mulf %371, %358 : vector<8x32xf32>
    %379 = arith.mulf %370, %376 : vector<8x32xf32>
    %380 = arith.addf %378, %379 : vector<8x32xf32>
    %381 = math.tanh %380 : vector<8x32xf32>
    %382 = arith.mulf %377, %381 : vector<8x32xf32>
    %383 = vector.extract_strided_slice %228 {offsets = [7, 0, 0], sizes = [1, 8, 128], strides = [1, 1, 1]} : vector<8x8x128xf32> to vector<1x8x128xf32>
    %384 = vector.shape_cast %383 : vector<1x8x128xf32> to vector<8x128xf32>
    %cst_105 = arith.constant dense<0.000000e+00> : vector<8x128xf32>
    %385 = tpu.matmul %382, %221, %cst_105 {dimension_numbers = #tpu.dot_dimension_numbers<[1], [0], [0], [1], [0, 0, 1, 1], [], []>} : vector<8x32xf32>, vector<32x128xf32>, vector<8x128xf32> -> vector<8x128xf32>
    %386 = arith.addf %384, %385 : vector<8x128xf32>
    %387 = arith.negf %386 : vector<8x128xf32>
    %388 = math.exp %387 : vector<8x128xf32>
    %cst_106 = arith.constant 1.000000e+00 : f32
    %389 = vector.broadcast %cst_106 : f32 to vector<8x128xf32>
    %390 = arith.addf %389, %388 : vector<8x128xf32>
    %391 = arith.divf %389, %390 : vector<8x128xf32>
    %392 = vector.extract_strided_slice %391 {offsets = [0, 0], sizes = [8, 32], strides = [1, 1]} : vector<8x128xf32> to vector<8x32xf32>
    %393 = vector.extract_strided_slice %391 {offsets = [0, 32], sizes = [8, 32], strides = [1, 1]} : vector<8x128xf32> to vector<8x32xf32>
    %394 = vector.extract_strided_slice %391 {offsets = [0, 64], sizes = [8, 32], strides = [1, 1]} : vector<8x128xf32> to vector<8x32xf32>
    %cst_107 = arith.constant 2.000000e+00 : f32
    %395 = vector.broadcast %cst_107 : f32 to vector<8x32xf32>
    %396 = arith.mulf %395, %394 : vector<8x32xf32>
    %cst_108 = arith.constant 1.000000e+00 : f32
    %397 = vector.broadcast %cst_108 : f32 to vector<8x32xf32>
    %398 = arith.subf %396, %397 : vector<8x32xf32>
    %399 = vector.extract_strided_slice %391 {offsets = [0, 96], sizes = [8, 32], strides = [1, 1]} : vector<8x128xf32> to vector<8x32xf32>
    %400 = arith.mulf %393, %380 : vector<8x32xf32>
    %401 = arith.mulf %392, %398 : vector<8x32xf32>
    %402 = arith.addf %400, %401 : vector<8x32xf32>
    %403 = math.tanh %402 : vector<8x32xf32>
    %404 = arith.mulf %399, %403 : vector<8x32xf32>
    %c0_109 = arith.constant 0 : index
    %c0_110 = arith.constant 0 : index
    %405 = vector.load %arg2[%c0_109, %c0_110] : memref<8x16xf32, #tpu.memory_space<vmem>>, vector<8x16xf32>
    %c0_111 = arith.constant 0 : index
    %c0_112 = arith.constant 0 : index
    %406 = vector.load %arg11[%c0_111, %c0_112] : memref<16x32xf32, #tpu.memory_space<vmem>>, vector<16x32xf32>
    %cst_113 = arith.constant dense<0.000000e+00> : vector<8x32xf32>
    %407 = tpu.matmul %405, %406, %cst_113 {dimension_numbers = #tpu.dot_dimension_numbers<[1], [0], [0], [1], [0, 0, 1, 1], [], []>} : vector<8x16xf32>, vector<16x32xf32>, vector<8x32xf32> -> vector<8x32xf32>
    %c0_114 = arith.constant 0 : index
    %c0_115 = arith.constant 0 : index
    %408 = vector.load %arg12[%c0_114, %c0_115] : memref<1x32xf32, #tpu.memory_space<vmem>>, vector<1x32xf32>
    %409 = vector.broadcast %408 : vector<1x32xf32> to vector<8x32xf32>
    %410 = arith.addf %407, %409 : vector<8x32xf32>
    %cst_116 = arith.constant 0.000000e+00 : f32
    %411 = vector.broadcast %cst_116 : f32 to vector<8x32xf32>
    %412 = arith.maximumf %410, %411 : vector<8x32xf32>
    %c0_117 = arith.constant 0 : index
    %c0_118 = arith.constant 0 : index
    %413 = vector.load %arg13[%c0_117, %c0_118] : memref<32x5xf32, #tpu.memory_space<vmem>>, vector<32x5xf32>
    %cst_119 = arith.constant dense<0.000000e+00> : vector<8x5xf32>
    %414 = tpu.matmul %404, %413, %cst_119 {dimension_numbers = #tpu.dot_dimension_numbers<[1], [0], [0], [1], [0, 0, 1, 1], [], []>} : vector<8x32xf32>, vector<32x5xf32>, vector<8x5xf32> -> vector<8x5xf32>
    %c0_120 = arith.constant 0 : index
    %c0_121 = arith.constant 0 : index
    %415 = vector.load %arg14[%c0_120, %c0_121] : memref<32x5xf32, #tpu.memory_space<vmem>>, vector<32x5xf32>
    %cst_122 = arith.constant dense<0.000000e+00> : vector<8x5xf32>
    %416 = tpu.matmul %412, %415, %cst_122 {dimension_numbers = #tpu.dot_dimension_numbers<[1], [0], [0], [1], [0, 0, 1, 1], [], []>} : vector<8x32xf32>, vector<32x5xf32>, vector<8x5xf32> -> vector<8x5xf32>
    %417 = arith.addf %414, %416 : vector<8x5xf32>
    %c0_123 = arith.constant 0 : index
    %c0_124 = arith.constant 0 : index
    %418 = vector.load %arg15[%c0_123, %c0_124] : memref<1x5xf32, #tpu.memory_space<vmem>>, vector<1x5xf32>
    %419 = vector.broadcast %418 : vector<1x5xf32> to vector<8x5xf32>
    %420 = arith.addf %417, %419 : vector<8x5xf32>
    %c0_125 = arith.constant 0 : index
    %c0_126 = arith.constant 0 : index
    %421 = vector.load %arg16[%c0_125, %c0_126] : memref<8x5xf32, #tpu.memory_space<vmem>>, vector<8x5xf32>
    tpu.vector_store %arg16[%c0_125, %c0_126], %420 {strides = array<i32>} : memref<8x5xf32, #tpu.memory_space<vmem>>, vector<8x5xf32>,
    return
  }
  func.func @transform_0(%arg0: i32) -> (i32, i32, i32) {
    %c0_i32 = arith.constant 0 : i32
    %c0_i32_0 = arith.constant 0 : i32
    %c0_i32_1 = arith.constant 0 : i32
    return %c0_i32, %arg0, %c0_i32_0 : i32, i32, i32
  }
  func.func @transform_1(%arg0: i32) -> (i32, i32) {
    %c0_i32 = arith.constant 0 : i32
    %c0_i32_0 = arith.constant 0 : i32
    return %arg0, %c0_i32 : i32, i32
  }
  func.func @transform_2(%arg0: i32) -> (i32, i32) {
    %c0_i32 = arith.constant 0 : i32
    %c0_i32_0 = arith.constant 0 : i32
    %c0_i32_1 = arith.constant 0 : i32
    return %c0_i32, %c0_i32_0 : i32, i32
  }
  func.func @transform_3(%arg0: i32) -> (i32, i32) {
    %c0_i32 = arith.constant 0 : i32
    %c0_i32_0 = arith.constant 0 : i32
    %c0_i32_1 = arith.constant 0 : i32
    return %c0_i32, %c0_i32_0 : i32, i32
  }
  func.func @transform_4(%arg0: i32) -> (i32, i32) {
    %c0_i32 = arith.constant 0 : i32
    %c0_i32_0 = arith.constant 0 : i32
    %c0_i32_1 = arith.constant 0 : i32
    return %c0_i32, %c0_i32_0 : i32, i32
  }
  func.func @transform_5(%arg0: i32) -> (i32, i32) {
    %c0_i32 = arith.constant 0 : i32
    %c0_i32_0 = arith.constant 0 : i32
    %c0_i32_1 = arith.constant 0 : i32
    return %c0_i32, %c0_i32_0 : i32, i32
  }
  func.func @transform_6(%arg0: i32) -> (i32, i32) {
    %c0_i32 = arith.constant 0 : i32
    %c0_i32_0 = arith.constant 0 : i32
    %c0_i32_1 = arith.constant 0 : i32
    return %c0_i32, %c0_i32_0 : i32, i32
  }
  func.func @transform_7(%arg0: i32) -> (i32, i32) {
    %c0_i32 = arith.constant 0 : i32
    %c0_i32_0 = arith.constant 0 : i32
    %c0_i32_1 = arith.constant 0 : i32
    return %c0_i32, %c0_i32_0 : i32, i32
  }
  func.func @transform_8(%arg0: i32) -> (i32, i32) {
    %c0_i32 = arith.constant 0 : i32
    %c0_i32_0 = arith.constant 0 : i32
    %c0_i32_1 = arith.constant 0 : i32
    return %c0_i32, %c0_i32_0 : i32, i32
  }
  func.func @transform_9(%arg0: i32) -> (i32, i32) {
    %c0_i32 = arith.constant 0 : i32
    %c0_i32_0 = arith.constant 0 : i32
    %c0_i32_1 = arith.constant 0 : i32
    return %c0_i32, %c0_i32_0 : i32, i32
  }
  func.func @transform_10(%arg0: i32) -> (i32, i32) {
    %c0_i32 = arith.constant 0 : i32
    %c0_i32_0 = arith.constant 0 : i32
    %c0_i32_1 = arith.constant 0 : i32
    return %c0_i32, %c0_i32_0 : i32, i32
  }
  func.func @transform_11(%arg0: i32) -> (i32, i32) {
    %c0_i32 = arith.constant 0 : i32
    %c0_i32_0 = arith.constant 0 : i32
    %c0_i32_1 = arith.constant 0 : i32
    return %c0_i32, %c0_i32_0 : i32, i32
  }
  func.func @transform_12(%arg0: i32) -> (i32, i32) {
    %c0_i32 = arith.constant 0 : i32
    %c0_i32_0 = arith.constant 0 : i32
    %c0_i32_1 = arith.constant 0 : i32
    return %c0_i32, %c0_i32_0 : i32, i32
  }
  func.func @transform_13(%arg0: i32) -> (i32, i32) {
    %c0_i32 = arith.constant 0 : i32
    %c0_i32_0 = arith.constant 0 : i32
    %c0_i32_1 = arith.constant 0 : i32
    return %c0_i32, %c0_i32_0 : i32, i32
  }
  func.func @transform_14(%arg0: i32) -> (i32, i32) {
    %c0_i32 = arith.constant 0 : i32
    %c0_i32_0 = arith.constant 0 : i32
    %c0_i32_1 = arith.constant 0 : i32
    return %c0_i32, %c0_i32_0 : i32, i32
  }
  func.func @transform_15(%arg0: i32) -> (i32, i32) {
    %c0_i32 = arith.constant 0 : i32
    %c0_i32_0 = arith.constant 0 : i32
    return %arg0, %c0_i32 : i32, i32
  }
}

</mosaic_0001>

<bundles_post_ra>
// kernel: tpu_custom_call.1
= control target key start
LH: loop header
LB: loop body
LE: loop exit
PB: predicated region body
PF: predicated region fallthrough
CT: control target
= control target key end

     0   :  { %20 = vsyncpa [#allocation4], 0  ;;  %s2388_s0 = inlined_call_operand.vmem [shape: f32[8,8,12], index: 0, kind: input, shape index: {}]   ;;  %s2389_s1 = inlined_call_operand.vmem [shape: f32[8,16], index: 1, kind: input, shape index: {}]   ;;  %s2390_s2 = inlined_call_operand.hbm [shape: f32[12,32], index: 2, kind: input, shape index: {}]   ;;  %s2391_s3 = inlined_call_operand.vmem [shape: f32[1,32], index: 3, kind: input, shape index: {}]   ;;  %s2392_s4 = inlined_call_operand.hbm [shape: f32[32,128], index: 4, kind: input, shape index: {}]   ;;  %s2393_s5 = inlined_call_operand.hbm [shape: f32[32,128], index: 5, kind: input, shape index: {}]   ;;  %s2394_s6 = inlined_call_operand.vmem [shape: f32[1,128], index: 6, kind: input, shape index: {}]   ;;  %s2395_s7 = inlined_call_operand.hbm [shape: f32[32,128], index: 7, kind: input, shape index: {}]   ;;  %s2396_s8 = inlined_call_operand.hbm [shape: f32[32,128], index: 8, kind: input, shape index: {}]   ;;  %s2397_s9 = inlined_call_operand.vmem [shape: f32[1,128], index: 9, kind: input, shape index: {}]   ;;  %s2398_s10 = inlined_call_operand.hbm [shape: f32[16,32], index: 10, kind: input, shape index: {}]   ;;  %s2399_s11 = inlined_call_operand.hbm [shape: f32[1,32], index: 11, kind: input, shape index: {}]   ;;  %s2400_s12 = inlined_call_operand.vmem [shape: f32[32,5], index: 12, kind: input, shape index: {}]   ;;  %s2401_s13 = inlined_call_operand.vmem [shape: f32[32,5], index: 13, kind: input, shape index: {}]   ;;  %s2402_s14 = inlined_call_operand.vmem [shape: f32[1,5], index: 14, kind: input, shape index: {}]   ;;  %s2403_s15 = inlined_call_operand.hbm [shape: f32[8,5], index: 15, kind: output, shape index: {}]  }
   0x1   :  { %21 = vsyncpa [#allocation7], 0 }
   0x2   :  { %22 = vsyncpa [#allocation10], 0 }
   0x3   :  { %23 = vsyncpa [#allocation13], 0 }
   0x4   :  { %24 = vsyncpa [#allocation5], 0  ;;  %s48_s20 = sshll.u32 %s2392_s4, 4  ;;  %s1961_s21 = smov [#allocation6]   ;;  %s49_s20 = int_to_ptr.hbm [resolvable:$true] %s48_s20 }
   0x5   :  { %s50_s22 = sshll.u32 %s1961_s21, 4  ;;  %s76_s25 = sshll.u32 %s2395_s7, 4  ;;  %s51_s22 = int_to_ptr.vmem [resolvable:$true] %s50_s22  ;;  %s77_s25 = int_to_ptr.hbm [resolvable:$true] %s76_s25 }
   0x6   :  { %s1962_s26 = smov 128   ;;  %s1963_s27 = smov 8  }
   0x7   :  { %56 = dma.hbm_to_vmem [thread:$0]  %s49_s20, 512, %s51_s22, [#allocation7], %s1962_s26, %s1962_s26, %s1963_s27  }
   0x8   :  { %s1964_s28 = smov [#allocation9]   ;;  %s104_s4 = sshll.u32 %s2398_s10, 4  ;;  %s105_s4 = int_to_ptr.hbm [resolvable:$true] %s104_s4 }
   0x9   :  { %s78_s29 = sshll.u32 %s1964_s28, 4  ;;  %s33_s18 = sshll.u32 %s2390_s2, 4  ;;  %s79_s29 = int_to_ptr.vmem [resolvable:$true] %s78_s29  ;;  %s34_s18 = int_to_ptr.hbm [resolvable:$true] %s33_s18 }
   0xa   :  { %84 = dma.hbm_to_vmem [thread:$0]  %s77_s25, 512, %s79_s29, [#allocation10], %s1962_s26, %s1962_s26, %s1963_s27  }
   0xb   :  { %s1965_s19 = smov [#allocation12]   ;;  %s1966_s20 = smov [#allocation3]  }
   0xc   :  { %s106_s21 = sshll.u32 %s1965_s19, 4  ;;  %s35_s10 = sshll.u32 %s1966_s20, 4  ;;  %s107_s21 = int_to_ptr.vmem [resolvable:$true] %s106_s21  ;;  %s36_s10 = int_to_ptr.vmem [resolvable:$true] %s35_s10 }
   0xd   :  { %112 = dma.hbm_to_vmem [thread:$0]  %s105_s4, 256, %s107_s21, [#allocation13], %s1962_s26, %s1962_s26, %s1963_s27  }
   0xe   :  { %s61_s24 = sshll.u32 %s2393_s5, 4  ;;  %s89_s28 = sshll.u32 %s2396_s8, 4  ;;  %s62_s24 = int_to_ptr.hbm [resolvable:$true] %s61_s24  ;;  %s90_s28 = int_to_ptr.hbm [resolvable:$true] %s89_s28 }
   0xf   :  { %41 = dma.hbm_to_vmem [thread:$0]  %s34_s18, 256, %s36_s10, [#allocation4], %s1962_s26, %s1962_s26, %s1963_s27  }
  0x10   :  { %s1967_s29 = smov [#allocation8]   ;;  %s1968_s16 = smov [#allocation11]  }
  0x11   :  { %s63_s30 = sshll.u32 %s1967_s29, 4  ;;  %s91_s5 = sshll.u32 %s1968_s16, 4  ;;  %s64_s30 = int_to_ptr.vmem [resolvable:$true] %s63_s30  ;;  %s92_s5 = int_to_ptr.vmem [resolvable:$true] %s91_s5 }
  0x12   :  { %69 = dma.hbm_to_vmem [thread:$0]  %s62_s24, 512, %s64_s30, [#allocation7], %s1962_s26, %s1962_s26, %s1963_s27  }
  0x13   :  { %s118_s17 = sshll.u32 %s2399_s11, 4  ;;  %s1969_s8 = smov [#allocation14]   ;;  %s119_s17 = int_to_ptr.hbm [resolvable:$true] %s118_s17 }
  0x14   :  { %97 = dma.hbm_to_vmem [thread:$0]  %s90_s28, 512, %s92_s5, [#allocation10], %s1962_s26, %s1962_s26, %s1963_s27  }
  0x15   :  { %s120_s18 = sshll.u32 %s1969_s8, 4  ;;  %s121_s18 = int_to_ptr.vmem [resolvable:$true] %s120_s18 }
  0x16   :  { %123 = dma.hbm_to_vmem [thread:$0]  %s119_s17, 16, %s121_s18, [#allocation13]  }
  0x17   :  { %1951 = dma.done.wait [#allocation4], 256  }
  0x18   :  { %1952 = vsyncadd [#allocation4], 4294967040 }
  0x19   :  { %1953 = dma.done.wait [#allocation7], 1024  }
  0x1a   :  { %1954 = vsyncadd [#allocation7], 4294966272 }
  0x1b   :  { %1955 = dma.done.wait [#allocation10], 1024  }
  0x1c   :  { %1956 = vsyncadd [#allocation10], 4294966272 }
  0x1d   :  { %1957 = dma.done.wait [#allocation13], 272  }
  0x1e   :  { %1958 = vsyncadd [#allocation13], 4294967024  ;;  %vm197_vm0 = vcmask 1043456   ;;  %v167_v0 = vld [vmem:[#allocation3 + $0x8] sm:$0xf]  ;;  %v166_v1 = vld [vmem:[#allocation3] sm:$0xff] }
  0x1f   :  { %1571 = vmatpush.msk.msra.mxu0 %vm197_vm0, %v167_v0  ;;  %v158_v2 = vld [vmem:[%s2388_s0] sm:$0xff]  ;;  %vm172_vm1 = vcmask 97280   ;;  %v159_v3 = vld [vmem:[%s2388_s0 + $0x8] sm:$0xff]  ;;  %v160_v4 = vld [vmem:[%s2388_s0 + $0x10] sm:$0xff]  ;;  %vm262_vm2 = vcmask 261120   ;;  %v1970_v43 = vmov 0.0  }
  0x20   :  { %v161_v5 = vld [vmem:[%s2388_s0 + $0x18] sm:$0xff]  ;;  %v253_v6 = vld [vmem:[#allocation6 + $0x18] sm:$0xff]  ;;  %v162_v7 = vld [vmem:[%s2388_s0 + $0x20] sm:$0xff]  ;;  %s1972_s7 = smov 32   ;;  %s1558_s4 = sshll.u32 %s2403_s15, 4  ;;  %s1559_s4 = int_to_ptr.hbm [resolvable:$true] %s1558_s4 }
  0x21   :  { %216 = vmatpush.msra.mxu0 %v166_v1  ;;  %299 = vmatpush.msra.mxu1 %v253_v6  ;;  %v163_v8 = vld [vmem:[%s2388_s0 + $0x28] sm:$0xff]  ;;  %v164_v9 = vld [vmem:[%s2388_s0 + $0x30] sm:$0xff]  ;;  %v165_v10 = vld [vmem:[%s2388_s0 + $0x38] sm:$0xff] }
  0x22   :  { %1572 = vmatmul.msk.f32.vlgmr.msra.gmra.mxu0 %vm172_vm1, %v158_v2  ;;  %v252_v11 = vld [vmem:[#allocation6 + $0x10] sm:$0xff]  ;;  %v251_v12 = vld [vmem:[#allocation6 + $0x8] sm:$0xff]  ;;  %v250_v13 = vld [vmem:[#allocation6] sm:$0xff] }
  0x23   :  { %300 = vmatpush.msra.mxu1 %v252_v11  ;;  %v2125_v14 = vld [vmem:[#allocation8 + $0x18] sm:$0xff]  ;;  %v2130_v15 = vld [vmem:[#allocation8 + $0x10] sm:$0xff]  ;;  %v2139_v20 = vld [vmem:[#allocation8 + $0x8] sm:$0xff] }
  0x24   :  { %409 = vmatpush.msra.mxu3 %v2125_v14  ;;  %476 = vmatpush.msra.mxu2 %v2125_v14  ;;  %v1658_v16 = vld [vmem:[%s2391_s3] ss:$0 sm:$0xff]  ;;  %v2146_v27 = vld [vmem:[#allocation8] sm:$0xff] }
  0x25   :  { %301 = vmatpush.msra.mxu1 %v251_v12  ;;  %v1659_v45 = vld [vmem:[%s2394_s6] ss:$0 sm:$0xff]  ;;  %s1971_s6 = smov 64  }
  0x26   :  { %410 = vmatpush.msra.mxu3 %v2130_v15  ;;  %477 = vmatpush.msra.mxu2 %v2130_v15 }
  0x27   :  { %302 = vmatpush.msra.mxu1 %v250_v13 }
  0x28   :  { %411 = vmatpush.msra.mxu3 %v2139_v20  ;;  %478 = vmatpush.msra.mxu2 %v2139_v20 }
  0x29   :  { %343 = vmatpush.msrb.mxu1 %v2125_v14 }
  0x2a   :  { %1573 = vmatmul.msk.f32.gmra.mxu0 %vm172_vm1, %v159_v3  ;;  %412 = vmatpush.msra.mxu3 %v2146_v27 }
  0x2b   :  { %344 = vmatpush.msrb.mxu1 %v2130_v15  ;;  %479 = vmatpush.msra.mxu2 %v2146_v27 }
  0x2c   :  { %543 = vmatpush.msrb.mxu3 %v2125_v14 }
  0x2d   :  { %345 = vmatpush.msrb.mxu1 %v2139_v20  ;;  %610 = vmatpush.msrb.mxu2 %v2125_v14 }
  0x2e   :  { %544 = vmatpush.msrb.mxu3 %v2130_v15 }
  0x2f   :  { %346 = vmatpush.msrb.mxu1 %v2146_v27  ;;  %611 = vmatpush.msrb.mxu2 %v2130_v15 }
  0x30   :  { %545 = vmatpush.msrb.mxu3 %v2139_v20 }
  0x31   :  { %612 = vmatpush.msrb.mxu2 %v2139_v20 }
  0x32   :  { %1574 = vmatmul.msk.f32.gmra.mxu0 %vm172_vm1, %v160_v4  ;;  %546 = vmatpush.msrb.mxu3 %v2146_v27 }
  0x33   :  { %613 = vmatpush.msrb.mxu2 %v2146_v27 }
  0x3a   :  { %1575 = vmatmul.msk.f32.gmra.mxu0 %vm172_vm1, %v161_v5 }
  0x42   :  { %1576 = vmatmul.msk.f32.gmra.mxu0 %vm172_vm1, %v162_v7 }
  0x4a   :  { %1577 = vmatmul.msk.f32.gmra.mxu0 %vm172_vm1, %v163_v8 }
  0x52   :  { %1578 = vmatmul.msk.f32.gmra.mxu0 %vm172_vm1, %v164_v9 }
  0x5a   :  { %1579 = vmatmul.msk.f32.gmra.mxu0 %vm172_vm1, %v165_v10 }
  0x9f   :  { %v218_v17 = vpop.f32.mrf.mxu0 }
  0xa0   :  { %v219_v18 = vadd.f32 %v1658_v16, %v218_v17 }
  0xa2   :  { %v242_v19 = vmax.f32 %v219_v18, 0.0 }
  0xa4   :  { %1580 = vmatmul.msk.f32.vlgmr.msra.gmra.mxu1 %vm262_vm2, %v242_v19 }
  0xa7   :  { %v221_v21 = vpop.f32.mrf.mxu0 }
  0xa8   :  { %v222_v22 = vadd.f32 %v1658_v16, %v221_v21 }
  0xaa   :  { %v243_v23 = vmax.f32 %v222_v22, 0.0 }
  0xac   :  { %1581 = vmatmul.msk.f32.gmra.mxu1 %vm262_vm2, %v243_v23 }
  0xaf   :  { %v224_v24 = vpop.f32.mrf.mxu0 }
  0xb0   :  { %v225_v25 = vadd.f32 %v1658_v16, %v224_v24 }
  0xb2   :  { %v244_v26 = vmax.f32 %v225_v25, 0.0 }
  0xb4   :  { %1582 = vmatmul.msk.f32.gmra.mxu1 %vm262_vm2, %v244_v26 }
  0xb7   :  { %v227_v28 = vpop.f32.mrf.mxu0 }
  0xb8   :  { %v228_v29 = vadd.f32 %v1658_v16, %v227_v28 }
  0xba   :  { %v245_v30 = vmax.f32 %v228_v29, 0.0 }
  0xbc   :  { %1583 = vmatmul.msk.f32.gmra.mxu1 %vm262_vm2, %v245_v30 }
  0xbf   :  { %v230_v31 = vpop.f32.mrf.mxu0 }
  0xc0   :  { %v231_v32 = vadd.f32 %v1658_v16, %v230_v31 }
  0xc2   :  { %v246_v33 = vmax.f32 %v231_v32, 0.0 }
  0xc4   :  { %1584 = vmatmul.msk.f32.gmra.mxu1 %vm262_vm2, %v246_v33 }
  0xc7   :  { %v233_v34 = vpop.f32.mrf.mxu0 }
  0xc8   :  { %v234_v35 = vadd.f32 %v1658_v16, %v233_v34 }
  0xca   :  { %v247_v36 = vmax.f32 %v234_v35, 0.0 }
  0xcc   :  { %1585 = vmatmul.msk.f32.gmra.mxu1 %vm262_vm2, %v247_v36 }
  0xcf   :  { %v236_v37 = vpop.f32.mrf.mxu0 }
  0xd0   :  { %v237_v38 = vadd.f32 %v1658_v16, %v236_v37 }
  0xd2   :  { %v248_v39 = vmax.f32 %v237_v38, 0.0 }
  0xd4   :  { %1586 = vmatmul.msk.f32.gmra.mxu1 %vm262_vm2, %v248_v39 }
  0xd7   :  { %v239_v40 = vpop.f32.mrf.mxu0 }
  0xd8   :  { %v240_v41 = vadd.f32 %v1658_v16, %v239_v40 }
  0xda   :  { %v249_v42 = vmax.f32 %v240_v41, 0.0 }
  0xdc   :  { %1587 = vmatmul.msk.f32.gmra.mxu1 %vm262_vm2, %v249_v42 }
  0xe4   :  { %347 = vmatmul.f32.vlgmr.msrb.gmra.mxu1 %v1970_v43 }
 0x121   :  { %v304_v44 = vpop.f32.mrf.mxu1 }
 0x122   :  { %v305_v60 = vadd.f32 %v1659_v45, %v304_v44 }
 0x129   :  { %v307_v46 = vpop.f32.mrf.mxu1 }
 0x12a   :  { %v308_v47 = vadd.f32 %v1659_v45, %v307_v46 }
 0x131   :  { %v310_v48 = vpop.f32.mrf.mxu1 }
 0x132   :  { %v2168_v49 = vadd.f32 %v1659_v45, %v310_v48 }
 0x139   :  { %v313_v50 = vpop.f32.mrf.mxu1 }
 0x13a   :  { %v2170_v51 = vadd.f32 %v1659_v45, %v313_v50 }
 0x141   :  { %v316_v52 = vpop.f32.mrf.mxu1 }
 0x142   :  { %v2172_v53 = vadd.f32 %v1659_v45, %v316_v52 }
 0x149   :  { %v319_v54 = vpop.f32.mrf.mxu1 }
 0x14a   :  { %v2174_v55 = vadd.f32 %v1659_v45, %v319_v54 }
 0x151   :  { %v322_v56 = vpop.f32.mrf.mxu1 }
 0x152   :  { %v2176_v57 = vadd.f32 %v1659_v45, %v322_v56 }
 0x159   :  { %v325_v58 = vpop.f32.mrf.mxu1 }
 0x15a   :  { %v2178_v59 = vadd.f32 %v1659_v45, %v325_v58 }
 0x161   :  { %v348_v61 = vpop.f32.mrf.mxu1 }
 0x162   :  { %v351_v62 = vadd.f32 %v348_v61, %v305_v60 }
 0x164   :  { %v1588_v63 = vmul.f32 -1.442695, %v351_v62 }
 0x166   :  { %1663 = vpow2.f32 %v1588_v63 }
 0x16c   :  { %v1664_v0 = vpop.eup %1663 }
 0x16d   :  { %v355_v1 = vadd.f32 1.0, %v1664_v0 }
 0x16f   :  { %1665 = vrcp.f32 %v355_v1  ;;  %v367_v5 = vand.u32 2147483648, %v355_v1  ;;  %v365_v7 = vand.u32 2147483647, %v355_v1  ;;  %vm361_vm4 = vweird.f32 %v355_v1 }
 0x171   :  { %v368_v9 = vor.u32 1.1754944e-38, %v367_v5  ;;  %vm366_vm6 = vcmp.eq.f32.partialorder %v365_v7, 8.507059e+37 }
 0x175   :  { %v1666_v2 = vpop.eup %1665 }
 0x176   :  { %v357_v3 = vmul.f32 %v1666_v2, %v355_v1  ;;  %vm362_vm3 = vweird.f32 %v1666_v2 }
 0x177   :  { %vm363_vm5 = vmor %vm361_vm4, %vm362_vm3 }
 0x178   :  { %v358_v4 = vsub.f32 1.0, %v357_v3 }
 0x17a   :  { %v359_v6 = vmul.f32 %v1666_v2, %v358_v4 }
 0x17c   :  { %v360_v8 = vadd.f32 %v1666_v2, %v359_v6 }
 0x17e   :  { %v364_v10 = vsel %vm363_vm5, %v1666_v2, %v360_v8 }
 0x17f   :  { %v369_v11 = vsel %vm366_vm6, %v368_v9, %v364_v10 }
 0x180   :  { %v371_v12 = vmul.f32 2.0, %v369_v11  ;;  %v373_v18 = vmul.f32 0.0, %v369_v11 }
 0x182   :  { %v1589_v13 = vadd.f32 -1.0, %v371_v12 }
 0x184   :  { %375 = vrot.lane.b32.xlu0 %v1589_v13, %s1971_s6 }
 0x1f6   :  { %v376_v16 = vpop.permute.xlu0 %375 }
 0x1f7   :  { %v378_v17 = vmul.f32 %v376_v16, %v369_v11 }
 0x1f9   :  { %380 = vrot.lane.b32.xlu0 %v378_v17, %s1972_s7 }
 0x26b   :  { %v381_v19 = vpop.permute.xlu0 %380 }
 0x26c   :  { %v383_v21 = vadd.f32 %v381_v19, %v373_v18 }
 0x26e   :  { %1667 = vtanh.f32 %v383_v21 }
 0x274   :  { %v1668_v22 = vpop.eup %1667 }
 0x275   :  { %386 = vrot.lane.b32.xlu1 %v1668_v22, %s1971_s6 }
 0x2e7   :  { %v387_v23 = vpop.permute.xlu1 %386 }
 0x2e8   :  { %v389_v24 = vmul.f32 %v387_v23, %v369_v11 }
 0x2ea   :  { %391 = vrot.lane.b32.xlu1 %v389_v24, %s1972_s7 }
 0x35c   :  { %v392_v25 = vpop.permute.xlu1 %391 }
 0x35d   :  { %394 = vst.msk [vmem:[#allocation2] sm:$0xff] %vm262_vm2, %v392_v25  ;;  %1590 = vmatmul.msk.f32.vlgmr.msra.gmra.mxu3 %vm262_vm2, %v392_v25 }
 0x35e   :  { %677 = vmatpush.msra.mxu3 %v2125_v14 }
 0x360   :  { %678 = vmatpush.msra.mxu3 %v2130_v15 }
 0x362   :  { %679 = vmatpush.msra.mxu3 %v2139_v20 }
 0x364   :  { %680 = vmatpush.msra.mxu3 %v2146_v27 }
 0x3e0   :  { %v414_v26 = vpop.f32.mrf.mxu3 }
 0x3e1   :  { %v417_v28 = vadd.f32 %v414_v26, %v308_v47 }
 0x3e3   :  { %v1591_v29 = vmul.f32 -1.442695, %v417_v28 }
 0x3e5   :  { %1669 = vpow2.f32 %v1591_v29 }
 0x3eb   :  { %v1670_v30 = vpop.eup %1669 }
 0x3ec   :  { %v421_v31 = vadd.f32 1.0, %v1670_v30 }
 0x3ee   :  { %1671 = vrcp.f32 %v421_v31  ;;  %v433_v35 = vand.u32 2147483648, %v421_v31  ;;  %v431_v37 = vand.u32 2147483647, %v421_v31  ;;  %vm427_vm8 = vweird.f32 %v421_v31 }
 0x3f0   :  { %v434_v39 = vor.u32 1.1754944e-38, %v433_v35  ;;  %vm432_vm10 = vcmp.eq.f32.partialorder %v431_v37, 8.507059e+37 }
 0x3f4   :  { %v1672_v32 = vpop.eup %1671 }
 0x3f5   :  { %v423_v33 = vmul.f32 %v1672_v32, %v421_v31  ;;  %vm428_vm7 = vweird.f32 %v1672_v32 }
 0x3f6   :  { %vm429_vm9 = vmor %vm427_vm8, %vm428_vm7 }
 0x3f7   :  { %v424_v34 = vsub.f32 1.0, %v423_v33 }
 0x3f9   :  { %v425_v36 = vmul.f32 %v1672_v32, %v424_v34 }
 0x3fb   :  { %v426_v38 = vadd.f32 %v1672_v32, %v425_v36 }
 0x3fd   :  { %v430_v40 = vsel %vm429_vm9, %v1672_v32, %v426_v38 }
 0x3fe   :  { %v435_v41 = vsel %vm432_vm10, %v434_v39, %v430_v40 }
 0x3ff   :  { %v437_v42 = vmul.f32 2.0, %v435_v41  ;;  %v439_v47 = vmul.f32 %v435_v41, %v383_v21 }
 0x401   :  { %v1592_v44 = vadd.f32 -1.0, %v437_v42 }
 0x403   :  { %441 = vrot.lane.b32.xlu2 %v1592_v44, %s1971_s6 }
 0x45d   :  { %v442_v45 = vpop.permute.xlu2 %441 }
 0x45e   :  { %v444_v46 = vmul.f32 %v442_v45, %v435_v41 }
 0x460   :  { %446 = vrot.lane.b32.xlu2 %v444_v46, %s1972_s7 }
 0x4ba   :  { %v447_v48 = vpop.permute.xlu2 %446 }
 0x4bb   :  { %v449_v50 = vadd.f32 %v447_v48, %v439_v47 }
 0x4bd   :  { %1673 = vtanh.f32 %v449_v50 }
 0x4c3   :  { %v1674_v52 = vpop.eup %1673 }
 0x4c4   :  { %452 = vrot.lane.b32.xlu0 %v1674_v52, %s1971_s6 }
 0x536   :  { %v453_v54 = vpop.permute.xlu0 %452 }
 0x537   :  { %v455_v56 = vmul.f32 %v453_v54, %v435_v41 }
 0x539   :  { %457 = vrot.lane.b32.xlu1 %v455_v56, %s1972_s7 }
 0x5ab   :  { %v458_v58 = vpop.permute.xlu1 %457 }
 0x5ac   :  { %461 = vst.msk [vmem:[#allocation2 + $0x8] sm:$0xff] %vm262_vm2, %v458_v58  ;;  %1593 = vmatmul.msk.f32.vlgmr.msra.gmra.mxu2 %vm262_vm2, %v458_v58 }
 0x5ad   :  { %744 = vmatpush.msra.mxu2 %v2125_v14 }
 0x5af   :  { %745 = vmatpush.msra.mxu2 %v2130_v15 }
 0x5b1   :  { %746 = vmatpush.msra.mxu2 %v2139_v20 }
 0x5b3   :  { %747 = vmatpush.msra.mxu2 %v2146_v27 }
 0x62f   :  { %v481_v60 = vpop.f32.mrf.mxu2 }
 0x630   :  { %v484_v61 = vadd.f32 %v481_v60, %v2168_v49 }
 0x632   :  { %v1594_v62 = vmul.f32 -1.442695, %v484_v61 }
 0x634   :  { %1675 = vpow2.f32 %v1594_v62 }
 0x63a   :  { %v1676_v63 = vpop.eup %1675 }
 0x63b   :  { %v488_v0 = vadd.f32 1.0, %v1676_v63 }
 0x63d   :  { %1677 = vrcp.f32 %v488_v0  ;;  %v500_v4 = vand.u32 2147483648, %v488_v0  ;;  %v498_v6 = vand.u32 2147483647, %v488_v0  ;;  %vm494_vm12 = vweird.f32 %v488_v0 }
 0x63f   :  { %v501_v8 = vor.u32 1.1754944e-38, %v500_v4  ;;  %vm499_vm14 = vcmp.eq.f32.partialorder %v498_v6, 8.507059e+37 }
 0x643   :  { %v1678_v1 = vpop.eup %1677 }
 0x644   :  { %v490_v2 = vmul.f32 %v1678_v1, %v488_v0  ;;  %vm495_vm11 = vweird.f32 %v1678_v1 }
 0x645   :  { %vm496_vm13 = vmor %vm494_vm12, %vm495_vm11 }
 0x646   :  { %v491_v3 = vsub.f32 1.0, %v490_v2 }
 0x648   :  { %v492_v5 = vmul.f32 %v1678_v1, %v491_v3 }
 0x64a   :  { %v493_v7 = vadd.f32 %v1678_v1, %v492_v5 }
 0x64c   :  { %v497_v9 = vsel %vm496_vm13, %v1678_v1, %v493_v7 }
 0x64d   :  { %v502_v10 = vsel %vm499_vm14, %v501_v8, %v497_v9 }
 0x64e   :  { %v504_v49 = vmul.f32 2.0, %v502_v10  ;;  %v506_v16 = vmul.f32 %v502_v10, %v449_v50 }
 0x650   :  { %v1595_v11 = vadd.f32 -1.0, %v504_v49 }
 0x652   :  { %508 = vrot.lane.b32.xlu2 %v1595_v11, %s1971_s6 }
 0x6ac   :  { %v509_v12 = vpop.permute.xlu2 %508 }
 0x6ad   :  { %v511_v13 = vmul.f32 %v509_v12, %v502_v10 }
 0x6af   :  { %513 = vrot.lane.b32.xlu0 %v511_v13, %s1972_s7 }
 0x721   :  { %v514_v17 = vpop.permute.xlu0 %513 }
 0x722   :  { %v516_v18 = vadd.f32 %v514_v17, %v506_v16 }
 0x724   :  { %1679 = vtanh.f32 %v516_v18 }
 0x72a   :  { %v1680_v19 = vpop.eup %1679 }
 0x72b   :  { %519 = vrot.lane.b32.xlu1 %v1680_v19, %s1971_s6 }
 0x79d   :  { %v520_v21 = vpop.permute.xlu1 %519 }
 0x79e   :  { %v522_v22 = vmul.f32 %v520_v21, %v502_v10 }
 0x7a0   :  { %524 = vrot.lane.b32.xlu2 %v522_v22, %s1972_s7 }
 0x7fa   :  { %v525_v23 = vpop.permute.xlu2 %524 }
 0x7fb   :  { %528 = vst.msk [vmem:[#allocation2 + $0x10] sm:$0xff] %vm262_vm2, %v525_v23  ;;  %1596 = vmatmul.msk.f32.vlgmr.msrb.gmra.mxu3 %vm262_vm2, %v525_v23 }
 0x7fc   :  { %811 = vmatpush.msrb.mxu3 %v2125_v14 }
 0x7fe   :  { %812 = vmatpush.msrb.mxu3 %v2130_v15 }
 0x800   :  { %813 = vmatpush.msrb.mxu3 %v2139_v20 }
 0x802   :  { %814 = vmatpush.msrb.mxu3 %v2146_v27 }
 0x87e   :  { %v548_v24 = vpop.f32.mrf.mxu3 }
 0x87f   :  { %v551_v25 = vadd.f32 %v548_v24, %v2170_v51 }
 0x881   :  { %v1597_v26 = vmul.f32 -1.442695, %v551_v25 }
 0x883   :  { %1681 = vpow2.f32 %v1597_v26 }
 0x889   :  { %v1682_v28 = vpop.eup %1681 }
 0x88a   :  { %v555_v29 = vadd.f32 1.0, %v1682_v28 }
 0x88c   :  { %1683 = vrcp.f32 %v555_v29  ;;  %v567_v33 = vand.u32 2147483648, %v555_v29  ;;  %v565_v14 = vand.u32 2147483647, %v555_v29  ;;  %vm561_vm0 = vweird.f32 %v555_v29 }
 0x88e   :  { %v568_v20 = vor.u32 1.1754944e-38, %v567_v33  ;;  %vm566_vm3 = vcmp.eq.f32.partialorder %v565_v14, 8.507059e+37 }
 0x892   :  { %v1684_v30 = vpop.eup %1683 }
 0x893   :  { %v557_v31 = vmul.f32 %v1684_v30, %v555_v29  ;;  %vm562_vm15 = vweird.f32 %v1684_v30 }
 0x894   :  { %vm563_vm1 = vmor %vm561_vm0, %vm562_vm15 }
 0x895   :  { %v558_v32 = vsub.f32 1.0, %v557_v31 }
 0x897   :  { %v559_v34 = vmul.f32 %v1684_v30, %v558_v32 }
 0x899   :  { %v560_v15 = vadd.f32 %v1684_v30, %v559_v34 }
 0x89b   :  { %v564_v27 = vsel %vm563_vm1, %v1684_v30, %v560_v15 }
 0x89c   :  { %v569_v35 = vsel %vm566_vm3, %v568_v20, %v564_v27 }
 0x89d   :  { %v571_v51 = vmul.f32 2.0, %v569_v35  ;;  %v573_v39 = vmul.f32 %v569_v35, %v516_v18 }
 0x89f   :  { %v1598_v36 = vadd.f32 -1.0, %v571_v51 }
 0x8a1   :  { %575 = vrot.lane.b32.xlu0 %v1598_v36, %s1971_s6  ;;  %v875_v36 = vld [vmem:[#allocation9 + $0x18] sm:$0xff] }
 0x913   :  { %v576_v37 = vpop.permute.xlu0 %575 }
 0x914   :  { %v578_v38 = vmul.f32 %v576_v37, %v569_v35  ;;  %v874_v37 = vld [vmem:[#allocation9 + $0x10] sm:$0xff] }
 0x916   :  { %580 = vrot.lane.b32.xlu1 %v578_v38, %s1972_s7  ;;  %v873_v38 = vld [vmem:[#allocation9 + $0x8] sm:$0xff] }
 0x988   :  { %v581_v40 = vpop.permute.xlu1 %580 }
 0x989   :  { %v583_v41 = vadd.f32 %v581_v40, %v573_v39  ;;  %v872_v39 = vld [vmem:[#allocation9] sm:$0xff] }
 0x98b   :  { %1685 = vtanh.f32 %v583_v41 }
 0x991   :  { %v1686_v42 = vpop.eup %1685 }
 0x992   :  { %586 = vrot.lane.b32.xlu2 %v1686_v42, %s1971_s6  ;;  %v865_v42 = vld [vmem:[#allocation2 + $0x8] sm:$0xff] }
 0x9ec   :  { %v587_v44 = vpop.permute.xlu2 %586 }
 0x9ed   :  { %v589_v45 = vmul.f32 %v587_v44, %v569_v35  ;;  %v866_v44 = vld [vmem:[#allocation2 + $0x10] sm:$0xff] }
 0x9ef   :  { %591 = vrot.lane.b32.xlu0 %v589_v45, %s1972_s7 }
 0xa61   :  { %v592_v46 = vpop.permute.xlu0 %591 }
 0xa62   :  { %595 = vst.msk [vmem:[#allocation2 + $0x18] sm:$0xff] %vm262_vm2, %v592_v46  ;;  %1599 = vmatmul.msk.f32.vlgmr.msrb.gmra.mxu2 %vm262_vm2, %v592_v46 }
 0xa63   :  { %920 = vmatpush.msrb.mxu2 %v875_v36 }
 0xa65   :  { %921 = vmatpush.msrb.mxu2 %v874_v37 }
 0xa67   :  { %922 = vmatpush.msrb.mxu2 %v873_v38 }
 0xa69   :  { %923 = vmatpush.msrb.mxu2 %v872_v39  ;;  %v867_v45 = vld [vmem:[#allocation2 + $0x18] sm:$0xff] }
 0xae5   :  { %v615_v47 = vpop.f32.mrf.mxu2 }
 0xae6   :  { %v618_v48 = vadd.f32 %v615_v47, %v2172_v53 }
 0xae8   :  { %v1600_v50 = vmul.f32 -1.442695, %v618_v48 }
 0xaea   :  { %1687 = vpow2.f32 %v1600_v50 }
 0xaf0   :  { %v1688_v52 = vpop.eup %1687 }
 0xaf1   :  { %v622_v54 = vadd.f32 1.0, %v1688_v52 }
 0xaf3   :  { %1689 = vrcp.f32 %v622_v54  ;;  %v634_v61 = vand.u32 2147483648, %v622_v54  ;;  %v632_v63 = vand.u32 2147483647, %v622_v54  ;;  %vm628_vm5 = vweird.f32 %v622_v54 }
 0xaf5   :  { %v635_v1 = vor.u32 1.1754944e-38, %v634_v61  ;;  %vm633_vm7 = vcmp.eq.f32.partialorder %v632_v63, 8.507059e+37 }
 0xaf9   :  { %v1690_v56 = vpop.eup %1689 }
 0xafa   :  { %v624_v58 = vmul.f32 %v1690_v56, %v622_v54  ;;  %vm629_vm4 = vweird.f32 %v1690_v56 }
 0xafb   :  { %vm630_vm6 = vmor %vm628_vm5, %vm629_vm4 }
 0xafc   :  { %v625_v60 = vsub.f32 1.0, %v624_v58 }
 0xafe   :  { %v626_v62 = vmul.f32 %v1690_v56, %v625_v60 }
 0xb00   :  { %v627_v0 = vadd.f32 %v1690_v56, %v626_v62 }
 0xb02   :  { %v631_v2 = vsel %vm630_vm6, %v1690_v56, %v627_v0 }
 0xb03   :  { %v636_v3 = vsel %vm633_vm7, %v635_v1, %v631_v2 }
 0xb04   :  { %v638_v53 = vmul.f32 2.0, %v636_v3  ;;  %v640_v7 = vmul.f32 %v636_v3, %v583_v41  ;;  %v864_v41 = vld [vmem:[#allocation2] sm:$0xff] }
 0xb06   :  { %v1601_v4 = vadd.f32 -1.0, %v638_v53 }
 0xb08   :  { %642 = vrot.lane.b32.xlu1 %v1601_v4, %s1971_s6 }
 0xb7a   :  { %v643_v5 = vpop.permute.xlu1 %642 }
 0xb7b   :  { %v645_v6 = vmul.f32 %v643_v5, %v636_v3 }
 0xb7d   :  { %647 = vrot.lane.b32.xlu2 %v645_v6, %s1972_s7 }
 0xbd7   :  { %v648_v8 = vpop.permute.xlu2 %647 }
 0xbd8   :  { %v650_v9 = vadd.f32 %v648_v8, %v640_v7 }
 0xbda   :  { %1691 = vtanh.f32 %v650_v9 }
 0xbe0   :  { %v1692_v10 = vpop.eup %1691 }
 0xbe1   :  { %653 = vrot.lane.b32.xlu0 %v1692_v10, %s1971_s6 }
 0xc53   :  { %v654_v49 = vpop.permute.xlu0 %653 }
 0xc54   :  { %v656_v11 = vmul.f32 %v654_v49, %v636_v3 }
 0xc56   :  { %658 = vrot.lane.b32.xlu1 %v656_v11, %s1972_s7 }
 0xcc8   :  { %v659_v12 = vpop.permute.xlu1 %658 }
 0xcc9   :  { %662 = vst.msk [vmem:[#allocation2 + $0x20] sm:$0xff] %vm262_vm2, %v659_v12  ;;  %1602 = vmatmul.msk.f32.vlgmr.msra.gmra.mxu3 %vm262_vm2, %v659_v12  ;;  %v2246_v12 = vld [vmem:[#allocation11 + $0x18] sm:$0xff] }
 0xcca   :  { %961 = vmatpush.msra.mxu3 %v2246_v12  ;;  %1217 = vmatpush.msrb.mxu0 %v2246_v12 }
 0xccb   :  { %1281 = vmatpush.msra.mxu1 %v2246_v12 }
 0xcd0   :  { %v868_v46 = vld [vmem:[#allocation2 + $0x20] sm:$0xff] }
 0xd4c   :  { %v682_v13 = vpop.f32.mrf.mxu3 }
 0xd4d   :  { %v685_v16 = vadd.f32 %v682_v13, %v2174_v55  ;;  %v2248_v13 = vld [vmem:[#allocation11 + $0x10] sm:$0xff] }
 0xd4e   :  { %962 = vmatpush.msra.mxu3 %v2248_v13  ;;  %1218 = vmatpush.msrb.mxu0 %v2248_v13 }
 0xd4f   :  { %v1603_v17 = vmul.f32 -1.442695, %v685_v16  ;;  %v2252_v16 = vld [vmem:[#allocation11 + $0x8] sm:$0xff]  ;;  %1282 = vmatpush.msra.mxu1 %v2248_v13 }
 0xd50   :  { %963 = vmatpush.msra.mxu3 %v2252_v16  ;;  %1219 = vmatpush.msrb.mxu0 %v2252_v16 }
 0xd51   :  { %1693 = vpow2.f32 %v1603_v17  ;;  %v2257_v17 = vld [vmem:[#allocation11] sm:$0xff]  ;;  %1283 = vmatpush.msra.mxu1 %v2252_v16 }
 0xd52   :  { %964 = vmatpush.msra.mxu3 %v2257_v17  ;;  %1220 = vmatpush.msrb.mxu0 %v2257_v17 }
 0xd53   :  { %1284 = vmatpush.msra.mxu1 %v2257_v17 }
 0xd54   :  { %1409 = vmatpush.msra.mxu0 %v2246_v12 }
 0xd56   :  { %1410 = vmatpush.msra.mxu0 %v2248_v13 }
 0xd57   :  { %v1694_v18 = vpop.eup %1693 }
 0xd58   :  { %v689_v19 = vadd.f32 1.0, %v1694_v18  ;;  %1411 = vmatpush.msra.mxu0 %v2252_v16 }
 0xd5a   :  { %1695 = vrcp.f32 %v689_v19  ;;  %v701_v24 = vand.u32 2147483648, %v689_v19  ;;  %v699_v26 = vand.u32 2147483647, %v689_v19  ;;  %vm695_vm9 = vweird.f32 %v689_v19  ;;  %1412 = vmatpush.msra.mxu0 %v2257_v17 }
 0xd5c   :  { %v702_v29 = vor.u32 1.1754944e-38, %v701_v24  ;;  %vm700_vm11 = vcmp.eq.f32.partialorder %v699_v26, 8.507059e+37 }
 0xd60   :  { %v1696_v21 = vpop.eup %1695 }
 0xd61   :  { %v691_v22 = vmul.f32 %v1696_v21, %v689_v19  ;;  %vm696_vm8 = vweird.f32 %v1696_v21 }
 0xd62   :  { %vm697_vm10 = vmor %vm695_vm9, %vm696_vm8 }
 0xd63   :  { %v692_v23 = vsub.f32 1.0, %v691_v22 }
 0xd65   :  { %v693_v25 = vmul.f32 %v1696_v21, %v692_v23  ;;  %v2288_v23 = vld [vmem:[%s2397_s9] ss:$0 sm:$0xff] }
 0xd67   :  { %v694_v28 = vadd.f32 %v1696_v21, %v693_v25 }
 0xd69   :  { %v698_v30 = vsel %vm697_vm10, %v1696_v21, %v694_v28 }
 0xd6a   :  { %v703_v31 = vsel %vm700_vm11, %v702_v29, %v698_v30 }
 0xd6b   :  { %v705_v55 = vmul.f32 2.0, %v703_v31  ;;  %v707_v14 = vmul.f32 %v703_v31, %v650_v9 }
 0xd6d   :  { %v1604_v32 = vadd.f32 -1.0, %v705_v55 }
 0xd6f   :  { %709 = vrot.lane.b32.xlu2 %v1604_v32, %s1971_s6 }
 0xdc9   :  { %v710_v33 = vpop.permute.xlu2 %709 }
 0xdca   :  { %v712_v34 = vmul.f32 %v710_v33, %v703_v31 }
 0xdcc   :  { %714 = vrot.lane.b32.xlu0 %v712_v34, %s1972_s7 }
 0xe3e   :  { %v715_v15 = vpop.permute.xlu0 %714 }
 0xe3f   :  { %v717_v20 = vadd.f32 %v715_v15, %v707_v14 }
 0xe41   :  { %1697 = vtanh.f32 %v717_v20 }
 0xe47   :  { %v1698_v27 = vpop.eup %1697 }
 0xe48   :  { %720 = vrot.lane.b32.xlu1 %v1698_v27, %s1971_s6 }
 0xeba   :  { %v721_v35 = vpop.permute.xlu1 %720 }
 0xebb   :  { %v723_v51 = vmul.f32 %v721_v35, %v703_v31 }
 0xebd   :  { %725 = vrot.lane.b32.xlu2 %v723_v51, %s1972_s7 }
 0xf17   :  { %v726_v40 = vpop.permute.xlu2 %725 }
 0xf18   :  { %729 = vst.msk [vmem:[#allocation2 + $0x28] sm:$0xff] %vm262_vm2, %v726_v40  ;;  %1605 = vmatmul.msk.f32.vlgmr.msra.gmra.mxu2 %vm262_vm2, %v726_v40 }
 0xf1f   :  { %v869_v47 = vld [vmem:[#allocation2 + $0x28] sm:$0xff] }
 0xf20   :  { %1611 = vmatmul.msk.f32.vlgmr.msrb.gmra.mxu2 %vm262_vm2, %v864_v41 }
 0xf28   :  { %1612 = vmatmul.msk.f32.gmra.mxu2 %vm262_vm2, %v865_v42 }
 0xf30   :  { %1613 = vmatmul.msk.f32.gmra.mxu2 %vm262_vm2, %v866_v44 }
 0xf38   :  { %1614 = vmatmul.msk.f32.gmra.mxu2 %vm262_vm2, %v867_v45 }
 0xf40   :  { %1615 = vmatmul.msk.f32.gmra.mxu2 %vm262_vm2, %v868_v46 }
 0xf48   :  { %1616 = vmatmul.msk.f32.gmra.mxu2 %vm262_vm2, %v869_v47 }
 0xf9b   :  { %v749_v48 = vpop.f32.mrf.mxu2 }
 0xf9c   :  { %v752_v50 = vadd.f32 %v749_v48, %v2176_v57 }
 0xf9e   :  { %v1606_v52 = vmul.f32 -1.442695, %v752_v50 }
 0xfa0   :  { %1699 = vpow2.f32 %v1606_v52 }
 0xfa3   :  { %v925_v24 = vpop.f32.mrf.mxu2 }
 0xfa6   :  { %v1700_v54 = vpop.eup %1699 }
 0xfa7   :  { %v756_v56 = vadd.f32 1.0, %v1700_v54 }
 0xfa9   :  { %1701 = vrcp.f32 %v756_v56  ;;  %v768_v62 = vand.u32 2147483648, %v756_v56  ;;  %v766_v0 = vand.u32 2147483647, %v756_v56  ;;  %vm762_vm13 = vweird.f32 %v756_v56 }
 0xfab   :  { %v769_v2 = vor.u32 1.1754944e-38, %v768_v62  ;;  %vm767_vm15 = vcmp.eq.f32.partialorder %v766_v0, 8.507059e+37  ;;  %v928_v46 = vpop.f32.mrf.mxu2 }
 0xfac   :  { %v929_v47 = vadd.f32 %v2288_v23, %v928_v46 }
 0xfaf   :  { %v1702_v58 = vpop.eup %1701 }
 0xfb0   :  { %v758_v60 = vmul.f32 %v1702_v58, %v756_v56  ;;  %vm763_vm12 = vweird.f32 %v1702_v58 }
 0xfb1   :  { %vm764_vm14 = vmor %vm762_vm13, %vm763_vm12 }
 0xfb2   :  { %v759_v61 = vsub.f32 1.0, %v758_v60 }
 0xfb4   :  { %v760_v63 = vmul.f32 %v1702_v58, %v759_v61 }
 0xfb6   :  { %v761_v1 = vadd.f32 %v1702_v58, %v760_v63 }
 0xfb8   :  { %v765_v3 = vsel %vm764_vm14, %v1702_v58, %v761_v1 }
 0xfb9   :  { %v770_v53 = vsel %vm767_vm15, %v769_v2, %v765_v3 }
 0xfba   :  { %v772_v57 = vmul.f32 2.0, %v770_v53  ;;  %v774_v7 = vmul.f32 %v770_v53, %v717_v20 }
 0xfbc   :  { %v1607_v4 = vadd.f32 -1.0, %v772_v57 }
 0xfbe   :  { %776 = vrot.lane.b32.xlu0 %v1607_v4, %s1971_s6 }
0x1030   :  { %v777_v5 = vpop.permute.xlu0 %776 }
0x1031   :  { %v779_v6 = vmul.f32 %v777_v5, %v770_v53 }
0x1033   :  { %781 = vrot.lane.b32.xlu1 %v779_v6, %s1972_s7 }
0x10a5   :  { %v782_v8 = vpop.permute.xlu1 %781 }
0x10a6   :  { %v2241_v9 = vadd.f32 %v782_v8, %v774_v7 }
0x10a8   :  { %1703 = vtanh.f32 %v2241_v9 }
0x10ae   :  { %v1704_v10 = vpop.eup %1703 }
0x10af   :  { %787 = vrot.lane.b32.xlu2 %v1704_v10, %s1971_s6 }
0x1109   :  { %v788_v49 = vpop.permute.xlu2 %787 }
0x110a   :  { %v790_v11 = vmul.f32 %v788_v49, %v770_v53 }
0x110c   :  { %792 = vrot.lane.b32.xlu0 %v790_v11, %s1972_s7 }
0x117e   :  { %v793_v18 = vpop.permute.xlu0 %792 }
0x117f   :  { %796 = vst.msk [vmem:[#allocation2 + $0x30] sm:$0xff] %vm262_vm2, %v793_v18  ;;  %1608 = vmatmul.msk.f32.vlgmr.msrb.gmra.mxu3 %vm262_vm2, %v793_v18 }
0x1180   :  { %1025 = vmatpush.msrb.mxu3 %v2246_v12 }
0x1182   :  { %1026 = vmatpush.msrb.mxu3 %v2248_v13 }
0x1184   :  { %1027 = vmatpush.msrb.mxu3 %v2252_v16 }
0x1186   :  { %v870_v19 = vld [vmem:[#allocation2 + $0x30] sm:$0xff]  ;;  %1028 = vmatpush.msrb.mxu3 %v2257_v17 }
0x1187   :  { %1617 = vmatmul.msk.f32.gmra.mxu2 %vm262_vm2, %v870_v19  ;;  %965 = vmatmul.f32.vlgmr.msra.gmra.mxu3 %v1970_v43  ;;  %v926_v43 = vadd.f32 %v2288_v23, %v925_v24 }
0x1188   :  { %1089 = vmatpush.msra.mxu3 %v2246_v12 }
0x118a   :  { %1090 = vmatpush.msra.mxu3 %v2248_v13 }
0x118c   :  { %1091 = vmatpush.msra.mxu3 %v2252_v16 }
0x118e   :  { %1092 = vmatpush.msra.mxu3 %v2257_v17 }
0x1202   :  { %v816_v21 = vpop.f32.mrf.mxu3 }
0x1203   :  { %v2283_v22 = vadd.f32 %v816_v21, %v2178_v59  ;;  %v931_v21 = vpop.f32.mrf.mxu2 }
0x1204   :  { %v932_v24 = vadd.f32 %v2288_v23, %v931_v21 }
0x120a   :  { %v966_v25 = vpop.f32.mrf.mxu3 }
0x120b   :  { %v969_v26 = vadd.f32 %v966_v25, %v926_v43 }
0x120d   :  { %v1619_v28 = vmul.f32 -1.442695, %v969_v26 }
0x120f   :  { %1705 = vpow2.f32 %v1619_v28 }
0x1215   :  { %v1706_v29 = vpop.eup %1705 }
0x1216   :  { %v973_v30 = vadd.f32 1.0, %v1706_v29 }
0x1218   :  { %1707 = vrcp.f32 %v973_v30  ;;  %v985_v59 = vand.u32 2147483648, %v973_v30  ;;  %v983_v34 = vand.u32 2147483647, %v973_v30  ;;  %vm979_vm1 = vweird.f32 %v973_v30 }
0x121a   :  { %v986_v15 = vor.u32 1.1754944e-38, %v985_v59  ;;  %vm984_vm4 = vcmp.eq.f32.partialorder %v983_v34, 8.507059e+37 }
0x121e   :  { %v1708_v31 = vpop.eup %1707 }
0x121f   :  { %v975_v55 = vmul.f32 %v1708_v31, %v973_v30  ;;  %vm980_vm0 = vweird.f32 %v1708_v31 }
0x1220   :  { %vm981_vm3 = vmor %vm979_vm1, %vm980_vm0 }
0x1221   :  { %v976_v32 = vsub.f32 1.0, %v975_v55 }
0x1223   :  { %v977_v33 = vmul.f32 %v1708_v31, %v976_v32 }
0x1225   :  { %v978_v14 = vadd.f32 %v1708_v31, %v977_v33 }
0x1227   :  { %v982_v20 = vsel %vm981_vm3, %v1708_v31, %v978_v14 }
0x1228   :  { %v987_v27 = vsel %vm984_vm4, %v986_v15, %v982_v20 }
0x1229   :  { %v989_v35 = vmul.f32 2.0, %v987_v27  ;;  %v991_v38 = vmul.f32 0.0, %v987_v27 }
0x122b   :  { %v1620_v51 = vadd.f32 -1.0, %v989_v35 }
0x122d   :  { %993 = vrot.lane.b32.xlu1 %v1620_v51, %s1971_s6 }
0x129f   :  { %v994_v36 = vpop.permute.xlu1 %993 }
0x12a0   :  { %v996_v37 = vmul.f32 %v994_v36, %v987_v27 }
0x12a2   :  { %998 = vrot.lane.b32.xlu2 %v996_v37, %s1972_s7 }
0x12fc   :  { %v999_v39 = vpop.permute.xlu2 %998 }
0x12fd   :  { %v1001_v40 = vadd.f32 %v999_v39, %v991_v38 }
0x12ff   :  { %1709 = vtanh.f32 %v1001_v40 }
0x1305   :  { %v1710_v41 = vpop.eup %1709 }
0x1306   :  { %1004 = vrot.lane.b32.xlu0 %v1710_v41, %s1971_s6 }
0x1378   :  { %v1005_v42 = vpop.permute.xlu0 %1004 }
0x1379   :  { %v1007_v44 = vmul.f32 %v1005_v42, %v987_v27 }
0x137b   :  { %1009 = vrot.lane.b32.xlu1 %v1007_v44, %s1972_s7 }
0x13ed   :  { %v1010_v45 = vpop.permute.xlu1 %1009 }
0x13ee   :  { %1621 = vmatmul.msk.f32.vlgmr.msrb.gmra.mxu3 %vm262_vm2, %v1010_v45 }
0x13ef   :  { %1153 = vmatpush.msrb.mxu3 %v2246_v12 }
0x13f1   :  { %1154 = vmatpush.msrb.mxu3 %v2248_v13 }
0x13f3   :  { %1155 = vmatpush.msrb.mxu3 %v2252_v16 }
0x13f5   :  { %1156 = vmatpush.msrb.mxu3 %v2257_v17 }
0x1471   :  { %v1030_v48 = vpop.f32.mrf.mxu3 }
0x1472   :  { %v1033_v50 = vadd.f32 %v1030_v48, %v929_v47 }
0x1474   :  { %v1622_v52 = vmul.f32 -1.442695, %v1033_v50 }
0x1476   :  { %1711 = vpow2.f32 %v1622_v52 }
0x147c   :  { %v1712_v54 = vpop.eup %1711 }
0x147d   :  { %v1037_v56 = vadd.f32 1.0, %v1712_v54 }
0x147f   :  { %1713 = vrcp.f32 %v1037_v56  ;;  %v1049_v62 = vand.u32 2147483648, %v1037_v56  ;;  %v1047_v0 = vand.u32 2147483647, %v1037_v56  ;;  %vm1043_vm6 = vweird.f32 %v1037_v56 }
0x1481   :  { %v1050_v2 = vor.u32 1.1754944e-38, %v1049_v62  ;;  %vm1048_vm8 = vcmp.eq.f32.partialorder %v1047_v0, 8.507059e+37 }
0x1485   :  { %v1714_v58 = vpop.eup %1713 }
0x1486   :  { %v1039_v60 = vmul.f32 %v1714_v58, %v1037_v56  ;;  %vm1044_vm5 = vweird.f32 %v1714_v58 }
0x1487   :  { %vm1045_vm7 = vmor %vm1043_vm6, %vm1044_vm5 }
0x1488   :  { %v1040_v61 = vsub.f32 1.0, %v1039_v60 }
0x148a   :  { %v1041_v63 = vmul.f32 %v1714_v58, %v1040_v61 }
0x148c   :  { %v1042_v1 = vadd.f32 %v1714_v58, %v1041_v63 }
0x148e   :  { %v1046_v3 = vsel %vm1045_vm7, %v1714_v58, %v1042_v1 }
0x148f   :  { %v1051_v53 = vsel %vm1048_vm8, %v1050_v2, %v1046_v3 }
0x1490   :  { %v1053_v57 = vmul.f32 2.0, %v1051_v53  ;;  %v1055_v7 = vmul.f32 %v1051_v53, %v1001_v40  ;;  %v934_v40 = vpop.f32.mrf.mxu2 }
0x1491   :  { %v935_v41 = vadd.f32 %v2288_v23, %v934_v40 }
0x1492   :  { %v1623_v4 = vadd.f32 -1.0, %v1053_v57 }
0x1494   :  { %1057 = vrot.lane.b32.xlu2 %v1623_v4, %s1971_s6 }
0x14ee   :  { %v1058_v5 = vpop.permute.xlu2 %1057 }
0x14ef   :  { %v1060_v6 = vmul.f32 %v1058_v5, %v1051_v53 }
0x14f1   :  { %1062 = vrot.lane.b32.xlu0 %v1060_v6, %s1972_s7 }
0x1563   :  { %v1063_v8 = vpop.permute.xlu0 %1062 }
0x1564   :  { %v1065_v10 = vadd.f32 %v1063_v8, %v1055_v7 }
0x1566   :  { %1715 = vtanh.f32 %v1065_v10 }
0x156c   :  { %v1716_v49 = vpop.eup %1715 }
0x156d   :  { %1068 = vrot.lane.b32.xlu1 %v1716_v49, %s1971_s6 }
0x15df   :  { %v1069_v11 = vpop.permute.xlu1 %1068 }
0x15e0   :  { %v1071_v18 = vmul.f32 %v1069_v11, %v1051_v53 }
0x15e2   :  { %1073 = vrot.lane.b32.xlu2 %v1071_v18, %s1972_s7 }
0x163c   :  { %v1074_v19 = vpop.permute.xlu2 %1073 }
0x163d   :  { %1624 = vmatmul.msk.f32.vlgmr.msra.gmra.mxu3 %vm262_vm2, %v1074_v19 }
0x163e   :  { %1345 = vmatpush.msra.mxu3 %v2246_v12 }
0x1640   :  { %1346 = vmatpush.msra.mxu3 %v2248_v13 }
0x1642   :  { %1347 = vmatpush.msra.mxu3 %v2252_v16 }
0x1644   :  { %1348 = vmatpush.msra.mxu3 %v2257_v17 }
0x16c0   :  { %v1094_v43 = vpop.f32.mrf.mxu3 }
0x16c1   :  { %v1097_v25 = vadd.f32 %v1094_v43, %v932_v24 }
0x16c3   :  { %v1625_v26 = vmul.f32 -1.442695, %v1097_v25 }
0x16c5   :  { %1717 = vpow2.f32 %v1625_v26 }
0x16cb   :  { %v1718_v28 = vpop.eup %1717 }
0x16cc   :  { %v1101_v29 = vadd.f32 1.0, %v1718_v28 }
0x16ce   :  { %1719 = vrcp.f32 %v1101_v29  ;;  %v1113_v12 = vand.u32 2147483648, %v1101_v29  ;;  %v1111_v13 = vand.u32 2147483647, %v1101_v29  ;;  %vm1107_vm10 = vweird.f32 %v1101_v29 }
0x16d0   :  { %v1114_v17 = vor.u32 1.1754944e-38, %v1113_v12  ;;  %vm1112_vm12 = vcmp.eq.f32.partialorder %v1111_v13, 8.507059e+37 }
0x16d4   :  { %v1720_v30 = vpop.eup %1719 }
0x16d5   :  { %v1103_v31 = vmul.f32 %v1720_v30, %v1101_v29  ;;  %vm1108_vm9 = vweird.f32 %v1720_v30 }
0x16d6   :  { %vm1109_vm11 = vmor %vm1107_vm10, %vm1108_vm9 }
0x16d7   :  { %v1104_v55 = vsub.f32 1.0, %v1103_v31 }
0x16d9   :  { %v1105_v32 = vmul.f32 %v1720_v30, %v1104_v55 }
0x16db   :  { %v1106_v16 = vadd.f32 %v1720_v30, %v1105_v32 }
0x16dd   :  { %v1110_v59 = vsel %vm1109_vm11, %v1720_v30, %v1106_v16 }
0x16de   :  { %v1115_v33 = vsel %vm1112_vm12, %v1114_v17, %v1110_v59 }
0x16df   :  { %v1117_v34 = vmul.f32 2.0, %v1115_v33  ;;  %v1119_v27 = vmul.f32 %v1115_v33, %v1065_v10  ;;  %v937_v10 = vpop.f32.mrf.mxu2 }
0x16e0   :  { %v938_v49 = vadd.f32 %v2288_v23, %v937_v10 }
0x16e1   :  { %v1626_v14 = vadd.f32 -1.0, %v1117_v34 }
0x16e3   :  { %1121 = vrot.lane.b32.xlu0 %v1626_v14, %s1971_s6 }
0x1755   :  { %v1122_v15 = vpop.permute.xlu0 %1121 }
0x1756   :  { %v1124_v20 = vmul.f32 %v1122_v15, %v1115_v33 }
0x1758   :  { %1126 = vrot.lane.b32.xlu1 %v1124_v20, %s1972_s7 }
0x17ca   :  { %v1127_v35 = vpop.permute.xlu1 %1126 }
0x17cb   :  { %v1129_v51 = vadd.f32 %v1127_v35, %v1119_v27 }
0x17cd   :  { %1721 = vtanh.f32 %v1129_v51 }
0x17d3   :  { %v1722_v36 = vpop.eup %1721 }
0x17d4   :  { %1132 = vrot.lane.b32.xlu2 %v1722_v36, %s1971_s6 }
0x182e   :  { %v1133_v37 = vpop.permute.xlu2 %1132 }
0x182f   :  { %v1135_v38 = vmul.f32 %v1133_v37, %v1115_v33 }
0x1831   :  { %1137 = vrot.lane.b32.xlu0 %v1135_v38, %s1972_s7 }
0x18a3   :  { %v1138_v39 = vpop.permute.xlu0 %1137 }
0x18a4   :  { %1627 = vmatmul.msk.f32.vlgmr.msrb.gmra.mxu3 %vm262_vm2, %v1138_v39 }
0x1927   :  { %v1158_v42 = vpop.f32.mrf.mxu3 }
0x1928   :  { %v1161_v44 = vadd.f32 %v1158_v42, %v935_v41 }
0x192a   :  { %v1628_v45 = vmul.f32 -1.442695, %v1161_v44 }
0x192c   :  { %1723 = vpow2.f32 %v1628_v45 }
0x1932   :  { %v1724_v46 = vpop.eup %1723 }
0x1933   :  { %v1165_v47 = vadd.f32 1.0, %v1724_v46 }
0x1935   :  { %1725 = vrcp.f32 %v1165_v47  ;;  %v1177_v54 = vand.u32 2147483648, %v1165_v47  ;;  %v1175_v58 = vand.u32 2147483647, %v1165_v47  ;;  %vm1171_vm14 = vweird.f32 %v1165_v47 }
0x1937   :  { %v1178_v61 = vor.u32 1.1754944e-38, %v1177_v54  ;;  %vm1176_vm0 = vcmp.eq.f32.partialorder %v1175_v58, 8.507059e+37 }
0x193b   :  { %v1726_v48 = vpop.eup %1725 }
0x193c   :  { %v1167_v50 = vmul.f32 %v1726_v48, %v1165_v47  ;;  %vm1172_vm13 = vweird.f32 %v1726_v48 }
0x193d   :  { %vm1173_vm15 = vmor %vm1171_vm14, %vm1172_vm13 }
0x193e   :  { %v1168_v52 = vsub.f32 1.0, %v1167_v50 }
0x1940   :  { %v1169_v56 = vmul.f32 %v1726_v48, %v1168_v52 }
0x1942   :  { %v1170_v60 = vadd.f32 %v1726_v48, %v1169_v56 }
0x1944   :  { %v1174_v62 = vsel %vm1173_vm15, %v1726_v48, %v1170_v60 }
0x1945   :  { %v1179_v63 = vsel %vm1176_vm0, %v1178_v61, %v1174_v62  ;;  %v1609_v61 = vmul.f32 -1.442695, %v2283_v22 }
0x1946   :  { %v1181_v0 = vmul.f32 2.0, %v1179_v63  ;;  %v1183_v53 = vmul.f32 %v1179_v63, %v1129_v51  ;;  %v940_v51 = vpop.f32.mrf.mxu2 }
0x1947   :  { %v941_v36 = vadd.f32 %v2288_v23, %v940_v51 }
0x1948   :  { %v1629_v1 = vadd.f32 -1.0, %v1181_v0 }
0x194a   :  { %1185 = vrot.lane.b32.xlu1 %v1629_v1, %s1971_s6 }
0x19bc   :  { %v1186_v2 = vpop.permute.xlu1 %1185 }
0x19bd   :  { %v1188_v3 = vmul.f32 %v1186_v2, %v1179_v63 }
0x19bf   :  { %1190 = vrot.lane.b32.xlu2 %v1188_v3, %s1972_s7 }
0x1a19   :  { %v1191_v57 = vpop.permute.xlu2 %1190 }
0x1a1a   :  { %v1193_v4 = vadd.f32 %v1191_v57, %v1183_v53 }
0x1a1c   :  { %1727 = vtanh.f32 %v1193_v4 }
0x1a22   :  { %v1728_v5 = vpop.eup %1727 }
0x1a23   :  { %1196 = vrot.lane.b32.xlu0 %v1728_v5, %s1971_s6 }
0x1a95   :  { %v1197_v6 = vpop.permute.xlu0 %1196 }
0x1a96   :  { %v1199_v7 = vmul.f32 %v1197_v6, %v1179_v63 }
0x1a98   :  { %1201 = vrot.lane.b32.xlu1 %v1199_v7, %s1972_s7 }
0x1b0a   :  { %v1202_v8 = vpop.permute.xlu1 %1201 }
0x1b0b   :  { %1630 = vmatmul.msk.f32.vlgmr.msrb.gmra.mxu0 %vm262_vm2, %v1202_v8 }
0x1b88   :  { %v1222_v11 = vpop.f32.mrf.mxu0 }
0x1b89   :  { %v1225_v18 = vadd.f32 %v1222_v11, %v938_v49 }
0x1b8b   :  { %v1631_v19 = vmul.f32 -1.442695, %v1225_v18 }
0x1b8d   :  { %1729 = vpow2.f32 %v1631_v19 }
0x1b93   :  { %v1730_v21 = vpop.eup %1729 }
0x1b94   :  { %v1229_v24 = vadd.f32 1.0, %v1730_v21 }
0x1b96   :  { %1731 = vrcp.f32 %v1229_v24  ;;  %v1241_v28 = vand.u32 2147483648, %v1229_v24  ;;  %v1239_v30 = vand.u32 2147483647, %v1229_v24  ;;  %vm1235_vm3 = vweird.f32 %v1229_v24 }
0x1b98   :  { %v1242_v55 = vor.u32 1.1754944e-38, %v1241_v28  ;;  %vm1240_vm5 = vcmp.eq.f32.partialorder %v1239_v30, 8.507059e+37 }
0x1b9c   :  { %v1732_v43 = vpop.eup %1731 }
0x1b9d   :  { %v1231_v25 = vmul.f32 %v1732_v43, %v1229_v24  ;;  %vm1236_vm1 = vweird.f32 %v1732_v43 }
0x1b9e   :  { %vm1237_vm4 = vmor %vm1235_vm3, %vm1236_vm1 }
0x1b9f   :  { %v1232_v26 = vsub.f32 1.0, %v1231_v25 }
0x1ba1   :  { %v1233_v29 = vmul.f32 %v1732_v43, %v1232_v26 }
0x1ba3   :  { %v1234_v31 = vadd.f32 %v1732_v43, %v1233_v29  ;;  %v943_v29 = vpop.f32.mrf.mxu2 }
0x1ba4   :  { %v944_v30 = vadd.f32 %v2288_v23, %v943_v29  ;;  %v1495_v29 = vld [vmem:[%s2401_s13 + $0x18] sm:$0xff] }
0x1ba5   :  { %v1238_v12 = vsel %vm1237_vm4, %v1732_v43, %v1234_v31  ;;  %1511 = vmatpush.msrb.mxu3 %v1495_v29 }
0x1ba6   :  { %v1243_v32 = vsel %vm1240_vm5, %v1242_v55, %v1238_v12 }
0x1ba7   :  { %v1245_v13 = vmul.f32 2.0, %v1243_v32  ;;  %v1247_v33 = vmul.f32 %v1243_v32, %v1193_v4 }
0x1ba9   :  { %v1632_v16 = vadd.f32 -1.0, %v1245_v13 }
0x1bab   :  { %1249 = vrot.lane.b32.xlu2 %v1632_v16, %s1971_s6 }
0x1c05   :  { %v1250_v17 = vpop.permute.xlu2 %1249 }
0x1c06   :  { %v1252_v59 = vmul.f32 %v1250_v17, %v1243_v32 }
0x1c08   :  { %1254 = vrot.lane.b32.xlu0 %v1252_v59, %s1972_s7 }
0x1c7a   :  { %v1255_v34 = vpop.permute.xlu0 %1254 }
0x1c7b   :  { %v1257_v14 = vadd.f32 %v1255_v34, %v1247_v33 }
0x1c7d   :  { %1733 = vtanh.f32 %v1257_v14 }
0x1c83   :  { %v1734_v15 = vpop.eup %1733 }
0x1c84   :  { %1260 = vrot.lane.b32.xlu1 %v1734_v15, %s1971_s6 }
0x1cf6   :  { %v1261_v20 = vpop.permute.xlu1 %1260 }
0x1cf7   :  { %v1263_v27 = vmul.f32 %v1261_v20, %v1243_v32 }
0x1cf9   :  { %1265 = vrot.lane.b32.xlu2 %v1263_v27, %s1972_s7 }
0x1d53   :  { %v1266_v35 = vpop.permute.xlu2 %1265 }
0x1d54   :  { %1633 = vmatmul.msk.f32.vlgmr.msra.gmra.mxu1 %vm262_vm2, %v1266_v35 }
0x1dd1   :  { %v1286_v37 = vpop.f32.mrf.mxu1 }
0x1dd2   :  { %v1289_v38 = vadd.f32 %v1286_v37, %v941_v36 }
0x1dd4   :  { %v1634_v39 = vmul.f32 -1.442695, %v1289_v38 }
0x1dd6   :  { %1735 = vpow2.f32 %v1634_v39 }
0x1ddc   :  { %v1736_v40 = vpop.eup %1735 }
0x1ddd   :  { %v1293_v41 = vadd.f32 1.0, %v1736_v40 }
0x1ddf   :  { %1737 = vrcp.f32 %v1293_v41  ;;  %v1305_v46 = vand.u32 2147483648, %v1293_v41  ;;  %v1303_v48 = vand.u32 2147483647, %v1293_v41  ;;  %vm1299_vm7 = vweird.f32 %v1293_v41 }
0x1de0   :  { %1739 = vpow2.f32 %v1609_v61 }
0x1de1   :  { %v1306_v52 = vor.u32 1.1754944e-38, %v1305_v46  ;;  %vm1304_vm9 = vcmp.eq.f32.partialorder %v1303_v48, 8.507059e+37 }
0x1de5   :  { %v1738_v42 = vpop.eup %1737 }
0x1de6   :  { %v1295_v44 = vmul.f32 %v1738_v42, %v1293_v41  ;;  %vm1300_vm6 = vweird.f32 %v1738_v42  ;;  %v1740_v62 = vpop.eup %1739 }
0x1de7   :  { %vm1301_vm8 = vmor %vm1299_vm7, %vm1300_vm6  ;;  %v823_v63 = vadd.f32 1.0, %v1740_v62  ;;  %vm1463_vm7 = vcmask 130048  }
0x1de8   :  { %v1296_v45 = vsub.f32 1.0, %v1295_v44 }
0x1de9   :  { %1741 = vrcp.f32 %v823_v63  ;;  %v835_v57 = vand.u32 2147483648, %v823_v63  ;;  %vm829_vm11 = vweird.f32 %v823_v63  ;;  %v833_v4 = vand.u32 2147483647, %v823_v63 }
0x1dea   :  { %v1297_v47 = vmul.f32 %v1738_v42, %v1296_v45 }
0x1deb   :  { %v836_v7 = vor.u32 1.1754944e-38, %v835_v57  ;;  %vm834_vm13 = vcmp.eq.f32.partialorder %v833_v4, 8.507059e+37 }
0x1dec   :  { %v1298_v50 = vadd.f32 %v1738_v42, %v1297_v47 }
0x1dee   :  { %v1302_v54 = vsel %vm1301_vm8, %v1738_v42, %v1298_v50  ;;  %vm1549_vm8 = vcmask 39936  }
0x1def   :  { %v1307_v56 = vsel %vm1304_vm9, %v1306_v52, %v1302_v54  ;;  %v1742_v0 = vpop.eup %1741 }
0x1df0   :  { %v1309_v58 = vmul.f32 2.0, %v1307_v56  ;;  %v825_v1 = vmul.f32 %v1742_v0, %v823_v63  ;;  %vm830_vm10 = vweird.f32 %v1742_v0  ;;  %v1311_v11 = vmul.f32 %v1307_v56, %v1257_v14 }
0x1df1   :  { %vm831_vm12 = vmor %vm829_vm11, %vm830_vm10 }
0x1df2   :  { %v1635_v60 = vadd.f32 -1.0, %v1309_v58  ;;  %v826_v2 = vsub.f32 1.0, %v825_v1 }
0x1df4   :  { %1313 = vrot.lane.b32.xlu0 %v1635_v60, %s1971_s6  ;;  %v827_v3 = vmul.f32 %v1742_v0, %v826_v2 }
0x1df6   :  { %v828_v53 = vadd.f32 %v1742_v0, %v827_v3 }
0x1df8   :  { %v832_v5 = vsel %vm831_vm12, %v1742_v0, %v828_v53 }
0x1df9   :  { %v837_v22 = vsel %vm834_vm13, %v836_v7, %v832_v5 }
0x1dfa   :  { %v839_v10 = vmul.f32 2.0, %v837_v22  ;;  %v841_v51 = vmul.f32 %v837_v22, %v2241_v9 }
0x1dfc   :  { %v1610_v49 = vadd.f32 -1.0, %v839_v10 }
0x1e66   :  { %v1314_v6 = vpop.permute.xlu0 %1313 }
0x1e67   :  { %v1316_v8 = vmul.f32 %v1314_v6, %v1307_v56 }
0x1e69   :  { %1318 = vrot.lane.b32.xlu1 %v1316_v8, %s1972_s7 }
0x1e71   :  { %843 = vrot.lane.b32.xlu1 %v1610_v49, %s1971_s6 }
0x1edb   :  { %v1319_v18 = vpop.permute.xlu1 %1318 }
0x1edc   :  { %v1321_v19 = vadd.f32 %v1319_v18, %v1311_v11 }
0x1ede   :  { %1743 = vtanh.f32 %v1321_v19 }
0x1ee3   :  { %v844_v25 = vpop.permute.xlu1 %843 }
0x1ee4   :  { %v1744_v21 = vpop.eup %1743  ;;  %v846_v26 = vmul.f32 %v844_v25, %v837_v22 }
0x1ee5   :  { %1324 = vrot.lane.b32.xlu2 %v1744_v21, %s1971_s6  ;;  %v1457_v21 = vld [vmem:[#allocation12] sm:$0xff] }
0x1f3f   :  { %v1325_v24 = vpop.permute.xlu2 %1324 }
0x1f40   :  { %v1327_v43 = vmul.f32 %v1325_v24, %v1307_v56  ;;  %v1456_v24 = vld [vmem:[%s2389_s1] sm:$0xff] }
0x1f42   :  { %1329 = vrot.lane.b32.xlu0 %v1327_v43, %s1972_s7 }
0x1f4a   :  { %848 = vrot.lane.b32.xlu0 %v846_v26, %s1972_s7 }
0x1fb4   :  { %v1330_v28 = vpop.permute.xlu0 %1329 }
0x1fb5   :  { %1636 = vmatmul.msk.f32.vlgmr.msra.gmra.mxu3 %vm262_vm2, %v1330_v28 }
0x1fbc   :  { %v849_v27 = vpop.permute.xlu0 %848 }
0x1fbd   :  { %v851_v38 = vadd.f32 %v849_v27, %v841_v51 }
0x2038   :  { %v1350_v31 = vpop.f32.mrf.mxu3 }
0x2039   :  { %v1353_v55 = vadd.f32 %v1350_v31, %v944_v30  ;;  %v1494_v30 = vld [vmem:[%s2401_s13 + $0x10] sm:$0xff]  ;;  %v1493_v31 = vld [vmem:[%s2401_s13 + $0x8] sm:$0xff] }
0x203a   :  { %1512 = vmatpush.msrb.mxu3 %v1494_v30 }
0x203b   :  { %v1637_v12 = vmul.f32 -1.442695, %v1353_v55  ;;  %v1492_v55 = vld [vmem:[%s2401_s13] sm:$0xff] }
0x203c   :  { %1513 = vmatpush.msrb.mxu3 %v1493_v31 }
0x203d   :  { %1745 = vpow2.f32 %v1637_v12  ;;  %v1491_v12 = vld [vmem:[%s2400_s12 + $0x18] sm:$0xff] }
0x203e   :  { %1536 = vmatpush.msrb.mxu0 %v1491_v12  ;;  %1514 = vmatpush.msrb.mxu3 %v1492_v55 }
0x2043   :  { %v1746_v32 = vpop.eup %1745 }
0x2044   :  { %v1357_v13 = vadd.f32 1.0, %v1746_v32  ;;  %v1490_v32 = vld [vmem:[%s2400_s12 + $0x10] sm:$0xff] }
0x2045   :  { %1537 = vmatpush.msrb.mxu0 %v1490_v32 }
0x2046   :  { %1747 = vrcp.f32 %v1357_v13  ;;  %v1369_v33 = vand.u32 2147483648, %v1357_v13  ;;  %v1367_v14 = vand.u32 2147483647, %v1357_v13  ;;  %vm1363_vm15 = vweird.f32 %v1357_v13 }
0x2047   :  { %1749 = vtanh.f32 %v851_v38 }
0x2048   :  { %v1370_v20 = vor.u32 1.1754944e-38, %v1369_v33  ;;  %vm1368_vm1 = vcmp.eq.f32.partialorder %v1367_v14, 8.507059e+37  ;;  %v1661_v33 = vld [vmem:[#allocation14] ss:$0 sm:$0xff] }
0x204c   :  { %v1748_v16 = vpop.eup %1747 }
0x204d   :  { %v1359_v17 = vmul.f32 %v1748_v16, %v1357_v13  ;;  %vm1364_vm14 = vweird.f32 %v1748_v16  ;;  %v1750_v40 = vpop.eup %1749  ;;  %v1489_v13 = vld [vmem:[%s2400_s12 + $0x8] sm:$0xff] }
0x204e   :  { %vm1365_vm0 = vmor %vm1363_vm15, %vm1364_vm14  ;;  %1538 = vmatpush.msrb.mxu0 %v1489_v13 }
0x204f   :  { %v1360_v59 = vsub.f32 1.0, %v1359_v17 }
0x2051   :  { %v1361_v34 = vmul.f32 %v1748_v16, %v1360_v59 }
0x2053   :  { %v1362_v15 = vadd.f32 %v1748_v16, %v1361_v34 }
0x2055   :  { %v1366_v35 = vsel %vm1365_vm0, %v1748_v16, %v1362_v15  ;;  %v1488_v16 = vld [vmem:[%s2400_s12] sm:$0xff]  ;;  %s1973_s12 = smov [#allocation15]  }
0x2056   :  { %v1371_v36 = vsel %vm1368_vm1, %v1370_v20, %v1366_v35  ;;  %1539 = vmatpush.msrb.mxu0 %v1488_v16  ;;  %v1662_v35 = vld [vmem:[%s2402_s14] ss:$0 sm:$0xff]  ;;  %s1556_s0 = sshll.u32 %s1973_s12, 4  ;;  %s1557_s0 = int_to_ptr.vmem [resolvable:$true] %s1556_s0 }
0x2057   :  { %v1373_v37 = vmul.f32 2.0, %v1371_v36  ;;  %v1375_v46 = vmul.f32 %v1371_v36, %v1321_v19  ;;  %v1458_v19 = vld [vmem:[#allocation12 + $0x8] sm:$0xff] }
0x2058   :  { %1481 = vmatpush.msrb.mxu1 %v1458_v19 }
0x2059   :  { %v1638_v39 = vadd.f32 -1.0, %v1373_v37 }
0x205a   :  { %1482 = vmatpush.msrb.mxu1 %v1457_v21 }
0x205b   :  { %1377 = vrot.lane.b32.xlu2 %v1638_v39, %s1971_s6  ;;  %1642 = vmatmul.msk.f32.vlgmr.msrb.gmra.mxu1 %vm1463_vm7, %v1456_v24 }
0x2063   :  { %854 = vrot.lane.b32.xlu2 %v1750_v40, %s1971_s6 }
0x20b5   :  { %v1378_v41 = vpop.permute.xlu2 %1377 }
0x20b6   :  { %v1380_v42 = vmul.f32 %v1378_v41, %v1371_v36 }
0x20b8   :  { %1382 = vrot.lane.b32.xlu1 %v1380_v42, %s1972_s7 }
0x20bd   :  { %v855_v44 = vpop.permute.xlu2 %854 }
0x20be   :  { %v857_v45 = vmul.f32 %v855_v44, %v837_v22 }
0x20c0   :  { %859 = vrot.lane.b32.xlu1 %v857_v45, %s1972_s7 }
0x20d8   :  { %v1484_v34 = vpop.f32.mrf.mxu1 }
0x20d9   :  { %v1485_v14 = vadd.f32 %v1661_v33, %v1484_v34 }
0x20db   :  { %v1487_v15 = vmax.f32 %v1485_v14, 0.0 }
0x20dd   :  { %1643 = vmatmul.msk.f32.vlgmr.msrb.gmra.mxu3 %vm262_vm2, %v1487_v15 }
0x212a   :  { %v1383_v9 = vpop.permute.xlu1 %1382 }
0x212b   :  { %v1385_v47 = vadd.f32 %v1383_v9, %v1375_v46 }
0x212d   :  { %1751 = vtanh.f32 %v1385_v47 }
0x2132   :  { %v860_v48 = vpop.permute.xlu1 %859 }
0x2133   :  { %v1752_v50 = vpop.eup %1751  ;;  %863 = vst.msk [vmem:[#allocation2 + $0x38] sm:$0xff] %vm262_vm2, %v860_v48 }
0x2134   :  { %1388 = vrot.lane.b32.xlu0 %v1752_v50, %s1971_s6 }
0x213a   :  { %v871_v52 = vld [vmem:[#allocation2 + $0x38] sm:$0xff] }
0x213b   :  { %1618 = vmatmul.msk.f32.gmra.mxu2 %vm262_vm2, %v871_v52 }
0x2160   :  { %v1516_v27 = vpop.f32.mrf.mxu3 }
0x21a6   :  { %v1389_v54 = vpop.permute.xlu0 %1388 }
0x21a7   :  { %v1391_v56 = vmul.f32 %v1389_v54, %v1371_v36 }
0x21a9   :  { %1393 = vrot.lane.b32.xlu2 %v1391_v56, %s1972_s7 }
0x21be   :  { %v946_v60 = vpop.f32.mrf.mxu2 }
0x21bf   :  { %v947_v61 = vadd.f32 %v2288_v23, %v946_v60 }
0x2203   :  { %v1394_v58 = vpop.permute.xlu2 %1393 }
0x2204   :  { %1639 = vmatmul.msk.f32.vlgmr.msra.gmra.mxu0 %vm262_vm2, %v1394_v58 }
0x2281   :  { %v1414_v62 = vpop.f32.mrf.mxu0 }
0x2282   :  { %v1417_v63 = vadd.f32 %v1414_v62, %v947_v61 }
0x2284   :  { %v1640_v0 = vmul.f32 -1.442695, %v1417_v63 }
0x2286   :  { %1753 = vpow2.f32 %v1640_v0 }
0x228c   :  { %v1754_v1 = vpop.eup %1753 }
0x228d   :  { %v1421_v2 = vadd.f32 1.0, %v1754_v1 }
0x228f   :  { %1755 = vrcp.f32 %v1421_v2  ;;  %v1433_v4 = vand.u32 2147483648, %v1421_v2  ;;  %v1431_v6 = vand.u32 2147483647, %v1421_v2  ;;  %vm1427_vm4 = vweird.f32 %v1421_v2 }
0x2291   :  { %v1434_v8 = vor.u32 1.1754944e-38, %v1433_v4  ;;  %vm1432_vm6 = vcmp.eq.f32.partialorder %v1431_v6, 8.507059e+37 }
0x2295   :  { %v1756_v3 = vpop.eup %1755 }
0x2296   :  { %v1423_v53 = vmul.f32 %v1756_v3, %v1421_v2  ;;  %vm1428_vm3 = vweird.f32 %v1756_v3 }
0x2297   :  { %vm1429_vm5 = vmor %vm1427_vm4, %vm1428_vm3 }
0x2298   :  { %v1424_v57 = vsub.f32 1.0, %v1423_v53 }
0x229a   :  { %v1425_v5 = vmul.f32 %v1756_v3, %v1424_v57 }
0x229c   :  { %v1426_v7 = vadd.f32 %v1756_v3, %v1425_v5 }
0x229e   :  { %v1430_v22 = vsel %vm1429_vm5, %v1756_v3, %v1426_v7 }
0x229f   :  { %v1435_v23 = vsel %vm1432_vm6, %v1434_v8, %v1430_v22 }
0x22a0   :  { %v1437_v10 = vmul.f32 2.0, %v1435_v23  ;;  %v1439_v43 = vmul.f32 %v1435_v23, %v1385_v47 }
0x22a2   :  { %v1641_v49 = vadd.f32 -1.0, %v1437_v10 }
0x22a4   :  { %1441 = vrot.lane.b32.xlu0 %v1641_v49, %s1971_s6 }
0x2316   :  { %v1442_v11 = vpop.permute.xlu0 %1441 }
0x2317   :  { %v1444_v18 = vmul.f32 %v1442_v11, %v1435_v23 }
0x2319   :  { %1446 = vrot.lane.b32.xlu1 %v1444_v18, %s1972_s7 }
0x238b   :  { %v1447_v25 = vpop.permute.xlu1 %1446 }
0x238c   :  { %v1449_v26 = vadd.f32 %v1447_v25, %v1439_v43 }
0x238e   :  { %1757 = vtanh.f32 %v1449_v26 }
0x2394   :  { %v1758_v28 = vpop.eup %1757 }
0x2395   :  { %1452 = vrot.lane.b32.xlu2 %v1758_v28, %s1971_s6 }
0x23ef   :  { %v1453_v17 = vpop.permute.xlu2 %1452 }
0x23f0   :  { %v1455_v59 = vmul.f32 %v1453_v17, %v1435_v23 }
0x23f2   :  { %1520 = vrot.lane.b32.xlu0 %v1455_v59, %s1972_s7 }
0x2464   :  { %v1521_v20 = vpop.permute.xlu0 %1520 }
0x2465   :  { %1644 = vmatmul.msk.f32.vlgmr.msrb.gmra.mxu0 %vm262_vm2, %v1521_v20 }
0x24e2   :  { %v1541_v51 = vpop.f32.mrf.mxu0 }
0x24e3   :  { %v1542_v36 = vadd.f32 %v1541_v51, %v1516_v27 }
0x24e5   :  { %v1548_v37 = vadd.f32 %v1662_v35, %v1542_v36 }
0x24e7   :  { %1550 = vst.msk [vmem:[#allocation15] sm:$0xff] %vm1549_vm8, %v1548_v37 }
0x24e8   :  { %1561 = dma.vmem_to_hbm [thread:$0]  %s1557_s0, 128, %s1559_s4, [#allocation5]  }
0x24e9   :  { %1959 = dma.done.wait [#allocation5], 128  }
0x24ea   :  { %1960 = vsyncadd [#allocation5], 4294967168 }
0x24eb   :  { %1566 = vsyncpa [#allocation4], 1 }
0x24ec   :  { %1567 = vsyncpa [#allocation7], 1 }
0x24ed   :  { %1568 = vsyncpa [#allocation10], 1 }
0x24ee   :  { %1569 = vsyncpa [#allocation13], 1 }
0x24ef   :  { %1570 = vsyncpa [#allocation5], 1 }

</bundles_post_ra>
